<compile_context>
chip_gen: v5e
topology: v5e:2x2
jax: 0.10.0
libtpu: 0.0.40
codegen_flags: <defaults>
</compile_context>

<pallas_src>
import jax
import jax.numpy as jnp
from jax.experimental import pallas as pl
from jax.experimental.pallas import tpu as pltpu


def spatio_conv_kernel(x_ref, l_ref, theta_ref, bias_ref, o_ref):
    # x_ref:     (Bb, c_in, T, N)   f32  VMEM
    # l_ref:     (Bb, N, N)         bf16 VMEM  (symmetric scaled Laplacian)
    # theta_ref: (c_in*c_out*Ks,)   f32  SMEM  flattened theta[i, o, k]
    # bias_ref:  (c_out,)           f32  SMEM
    # o_ref:     (Bb, c_out, T, N)  f32  VMEM
    Bb, c_in, T, N = x_ref.shape
    c_out = o_ref.shape[1]
    Ks = theta_ref.shape[0] // (c_in * c_out)

    # Per-batch operands.  The reshape is free because T % 8 == 0 (enforced
    # by wrapper padding), so (c_in, T, N) -> (c_in*T, N) stays tile-aligned.
    ls = [l_ref[b] for b in range(Bb)]                        # bf16 (N, N)
    x2 = [x_ref[b].reshape(c_in * T, N) for b in range(Bb)]   # f32  (c_in*T, N)

    # Chebyshev recurrence on the signal (L symmetric => x @ T_k(L)^T == x @ T_k(L)),
    # interleaved across the independent batches in the block so consecutive
    # MXU dots have no data dependence.  bf16 inputs, f32 accumulation.
    xc = [[x2[b]] for b in range(Bb)]                         # xc[b][k], f32
    if Ks >= 2:
        for b in range(Bb):
            xc[b].append(jnp.dot(x2[b].astype(jnp.bfloat16), ls[b],
                                 preferred_element_type=jnp.float32))
    for _ in range(2, Ks):
        for b in range(Bb):
            xc[b].append(
                2.0 * jnp.dot(xc[b][-1].astype(jnp.bfloat16), ls[b],
                              preferred_element_type=jnp.float32)
                - xc[b][-2])

    # theta contraction + bias + ReLU: channel dims are tiny -> SMEM scalar
    # weights + VPU accumulation, written as lane-dense (T, N) slabs.
    for b in range(Bb):
        tiles = [xc[b][k][i * T:(i + 1) * T, :]
                 for k in range(Ks) for i in range(c_in)]
        for o in range(c_out):
            acc = jnp.full((T, N), bias_ref[o], dtype=jnp.float32)
            for k in range(Ks):
                for i in range(c_in):
                    w = theta_ref[(i * c_out + o) * Ks + k]
                    acc = acc + w * tiles[k * c_in + i]
            o_ref[b, o] = jnp.maximum(acc, 0.0).astype(o_ref.dtype)


def _lambda_max_power(L, num_iters=64):
    """Largest eigenvalue of the (symmetric PSD) normalized Laplacian via
    power iteration — O(B*N^2*iters) instead of O(B*N^3) eigendecomposition."""
    B, N, _ = L.shape
    # Fixed pseudo-random start vector (the all-ones vector is near the
    # null-space of a normalized Laplacian, so don't use it).
    v0 = jax.random.normal(jax.random.PRNGKey(0), (N, 1), dtype=L.dtype)
    v = jnp.broadcast_to(v0, (B, N, 1))
    v = v / (jnp.linalg.norm(v, axis=1, keepdims=True) + 1e-12)

    def body(_, v):
        w = jnp.matmul(L, v)
        return w / (jnp.linalg.norm(w, axis=1, keepdims=True) + 1e-12)

    v = jax.lax.fori_loop(0, num_iters, body, v)
    return jnp.sum(v * jnp.matmul(L, v), axis=(1, 2))        # Rayleigh quotient


def scaled_laplacian(W, num_iters=64):
    """W: (B, N, N) SYMMETRIC non-negative weighted adjacency -> scaled Laplacian.

    NOTE: symmetry of W is required — the kernel contracts x @ L (no transpose)
    and lambda_max is found with symmetric power iteration."""
    _, N, _ = W.shape
    eye = jnp.eye(N, dtype=W.dtype)
    d = jnp.sum(W, axis=2)                                    # (B, N)
    L = -W * (1.0 - eye) + d[:, :, None] * eye                # diag <- d, off-diag <- -W
    d_sqrt = jnp.sqrt(jnp.maximum(d[:, :, None] * d[:, None, :], 1e-12))
    L = L / d_sqrt
    # TODO(synk): torch.linalg.eigvals (dense eigendecomposition) has no Pallas/TPU
    # equivalent; lambda_max is approximated with power iteration (cheap matvecs).
    lam_max = _lambda_max_power(L, num_iters)
    return 2.0 * L / lam_max[:, None, None] - eye


def _pick_block_b(B, max_block=8):
    """Largest divisor of B (<= max_block) that still leaves >= 2 grid steps,
    so both v7x TensorCores get work; falls back to 1."""
    best = 1
    for bb in range(2, max_block + 1):
        if B % bb == 0 and B // bb >= 2:
            best = bb
    return best


def spatio_conv_forward(x, graph_input, theta, b, *, block_b=None, power_iters=64):
    """x: (B, c_in, T, N), graph_input: (B, N, N) symmetric, theta: (c_in, c_out, Ks),
    b: (1, c_out, 1, 1).  Returns (B, c_out, T, N) float32."""
    B, c_in, T, N = x.shape
    c_in2, c_out, Ks = theta.shape
    assert c_in2 == c_in

    L = scaled_laplacian(graph_input.astype(jnp.float32), power_iters)  # (B, N, N)
    # L is symmetric -> pass it directly (no materialized transpose).

    # Pad T to a sublane multiple (8) and N to a lane multiple (128): keeps the
    # in-kernel reshape a free view and the output stores unmasked lane-dense.
    Tp = ((T + 7) // 8) * 8
    Np = ((N + 127) // 128) * 128
    if Tp != T or Np != N:
        x = jnp.pad(x, ((0, 0), (0, 0), (0, Tp - T), (0, Np - N)))
        L = jnp.pad(L, ((0, 0), (0, Np - N), (0, Np - N)))

    if block_b is None:
        block_b = _pick_block_b(B)
    assert B % block_b == 0, (B, block_b)

    theta_flat = jnp.reshape(theta, (c_in * c_out * Ks,)).astype(jnp.float32)
    bias_flat = jnp.reshape(b, (c_out,)).astype(jnp.float32)

    # TODO(synk): training-mode dropout (p=0.3) omitted — eval/inference semantics
    # (F.dropout is the identity when training=False).
    # TODO(synk): if B ever drops below 2 grid steps on v7x, add a second
    # "parallel" grid axis over T (rows of the recurrence are independent).
    out = pl.pallas_call(
        spatio_conv_kernel,
        out_shape=jax.ShapeDtypeStruct((B, c_out, Tp, Np), jnp.float32),
        grid_spec=pltpu.PrefetchScalarGridSpec(
            num_scalar_prefetch=0,
            grid=(B // block_b,),
            in_specs=[
                pl.BlockSpec((block_b, c_in, Tp, Np),
                             lambda bi: (bi, 0, 0, 0)),                 # x (f32)
                # L is the heaviest per-step DMA; default double-buffering is
                # plenty at these sizes (bump pipeline_mode=pl.Buffered(3) only
                # if profiling at much larger N shows exposed DMA).
                pl.BlockSpec((block_b, Np, Np),
                             lambda bi: (bi, 0, 0)),                    # L (bf16)
                pl.BlockSpec(memory_space=pltpu.MemorySpace.SMEM),      # theta
                pl.BlockSpec(memory_space=pltpu.MemorySpace.SMEM),      # bias
            ],
            out_specs=pl.BlockSpec((block_b, c_out, Tp, Np),
                                   lambda bi: (bi, 0, 0, 0)),
        ),
        compiler_params=pltpu.CompilerParams(
            dimension_semantics=("parallel",)),
    )(x.astype(jnp.float32), L.astype(jnp.bfloat16), theta_flat, bias_flat)

    return out[:, :, :T, :N]


def spatio_conv_reference(x, graph_input, theta, b, *, power_iters=64):
    """Pure-JAX (f32) reproduction of the PyTorch forward (eval mode), sharing
    the same lambda_max approximation so the comparison isolates kernel error."""
    L = scaled_laplacian(graph_input.astype(jnp.float32), power_iters)  # (B, N, N)
    B, N = L.shape[0], L.shape[1]
    Ks = theta.shape[2]
    L0 = jnp.broadcast_to(jnp.eye(N, dtype=L.dtype), (B, N, N))
    Ls = [L0, L]
    for _ in range(Ks - 2):
        Ls.append(2.0 * jnp.einsum('bij,bjk->bik', L, Ls[-1]) - Ls[-2])
    Lk = jnp.stack(Ls[:Ks], axis=1)                           # (B, Ks, N, N)
    x_c = jnp.einsum('bknm,bitm->bitkn', Lk, x)
    x_gc = jnp.einsum('iok,bitkn->botn', theta, x_c) + b
    return jax.nn.relu(x_gc)


if __name__ == "__main__":
    # batch, c_in, c_out, input_length (sublane multiple), num_nodes (lane-dense), Ks
    B, c_in, c_out, T, N, Ks = 4, 4, 4, 8, 128, 3

    key = jax.random.PRNGKey(0)
    kx, kw, kt, kb = jax.random.split(key, 4)

    x = jax.random.normal(kx, (B, c_in, T, N), dtype=jnp.float32)
    A = jax.random.uniform(kw, (B, N, N), dtype=jnp.float32, minval=0.1, maxval=1.0)
    graph = 0.5 * (A + jnp.swapaxes(A, 1, 2))    # symmetric positive adjacency

    # The no-transpose kernel relies on a symmetric adjacency — verify the test data.
    assert float(jnp.max(jnp.abs(graph - jnp.swapaxes(graph, 1, 2)))) < 1e-6

    theta = jax.random.normal(kt, (c_in, c_out, Ks), dtype=jnp.float32) / jnp.sqrt(c_in * Ks)
    b = jax.random.normal(kb, (1, c_out, 1, 1), dtype=jnp.float32) * 0.1

    out = spatio_conv_forward(x, graph, theta, b)
    out = jax.block_until_ready(out)
    assert out.shape == (B, c_out, T, N), out.shape

    ref = spatio_conv_reference(x, graph, theta, b)
    # bf16 MXU inputs (f32 accumulate) -> compare with a relative tolerance.
    abs_err = float(jnp.max(jnp.abs(out - ref)))
    denom = float(jnp.max(jnp.abs(ref))) + 1e-6
    assert abs_err / denom < 3e-2, (abs_err, denom)

    print("KERNEL_OK")
</pallas_src>

<mosaic_0001>
module attributes {stable_mosaic.version = 11 : i64} {
  func.func @spatio_conv_kernel(%arg0: i32, %arg1: memref<2x4x8x128xf32, #tpu.memory_space<vmem>>, %arg2: memref<2x128x128xbf16, #tpu.memory_space<vmem>>, %arg3: memref<48xf32, #tpu.memory_space<smem>>, %arg4: memref<4xf32, #tpu.memory_space<smem>>, %arg5: memref<2x4x8x128xf32, #tpu.memory_space<vmem>>) attributes {dimension_semantics = [#tpu.dimension_semantics<parallel>], iteration_bounds = array<i64: 2>, scalar_prefetch = 0 : i64, scratch_operands = 0 : i64, tpu.core_type = #tpu.core_type<tc>, window_params = [{transform_indices = @transform_0, window_bounds = array<i64: 2, 4, 8, 128>}, {transform_indices = @transform_1, window_bounds = array<i64: 2, 128, 128>}, {transform_indices = @transform_2, window_bounds = array<i64: 48>}, {transform_indices = @transform_3, window_bounds = array<i64: 4>}, {transform_indices = @transform_4, window_bounds = array<i64: 2, 4, 8, 128>}]} {
    %c0 = arith.constant 0 : index
    %c0_0 = arith.constant 0 : index
    %c0_1 = arith.constant 0 : index
    %0 = vector.load %arg2[%c0, %c0_0, %c0_1] : memref<2x128x128xbf16, #tpu.memory_space<vmem>>, vector<1x128x128xbf16>
    %1 = vector.shape_cast %0 : vector<1x128x128xbf16> to vector<128x128xbf16>
    %c1 = arith.constant 1 : index
    %c0_2 = arith.constant 0 : index
    %c0_3 = arith.constant 0 : index
    %2 = vector.load %arg2[%c1, %c0_2, %c0_3] : memref<2x128x128xbf16, #tpu.memory_space<vmem>>, vector<1x128x128xbf16>
    %3 = vector.shape_cast %2 : vector<1x128x128xbf16> to vector<128x128xbf16>
    %c0_4 = arith.constant 0 : index
    %c0_5 = arith.constant 0 : index
    %c0_6 = arith.constant 0 : index
    %c0_7 = arith.constant 0 : index
    %4 = vector.load %arg1[%c0_4, %c0_5, %c0_6, %c0_7] : memref<2x4x8x128xf32, #tpu.memory_space<vmem>>, vector<1x4x8x128xf32>
    %5 = vector.shape_cast %4 : vector<1x4x8x128xf32> to vector<4x8x128xf32>
    %6 = vector.shape_cast %5 : vector<4x8x128xf32> to vector<32x128xf32>
    %c1_8 = arith.constant 1 : index
    %c0_9 = arith.constant 0 : index
    %c0_10 = arith.constant 0 : index
    %c0_11 = arith.constant 0 : index
    %7 = vector.load %arg1[%c1_8, %c0_9, %c0_10, %c0_11] : memref<2x4x8x128xf32, #tpu.memory_space<vmem>>, vector<1x4x8x128xf32>
    %8 = vector.shape_cast %7 : vector<1x4x8x128xf32> to vector<4x8x128xf32>
    %9 = vector.shape_cast %8 : vector<4x8x128xf32> to vector<32x128xf32>
    %10 = arith.truncf %6 : vector<32x128xf32> to vector<32x128xbf16>
    %cst = arith.constant dense<0.000000e+00> : vector<32x128xf32>
    %11 = tpu.matmul %10, %1, %cst {dimension_numbers = #tpu.dot_dimension_numbers<[1], [0], [0], [1], [0, 0, 1, 1], [], []>} : vector<32x128xbf16>, vector<128x128xbf16>, vector<32x128xf32> -> vector<32x128xf32>
    %12 = arith.truncf %9 : vector<32x128xf32> to vector<32x128xbf16>
    %cst_12 = arith.constant dense<0.000000e+00> : vector<32x128xf32>
    %13 = tpu.matmul %12, %3, %cst_12 {dimension_numbers = #tpu.dot_dimension_numbers<[1], [0], [0], [1], [0, 0, 1, 1], [], []>} : vector<32x128xbf16>, vector<128x128xbf16>, vector<32x128xf32> -> vector<32x128xf32>
    %14 = arith.truncf %11 : vector<32x128xf32> to vector<32x128xbf16>
    %cst_13 = arith.constant dense<0.000000e+00> : vector<32x128xf32>
    %15 = tpu.matmul %14, %1, %cst_13 {dimension_numbers = #tpu.dot_dimension_numbers<[1], [0], [0], [1], [0, 0, 1, 1], [], []>} : vector<32x128xbf16>, vector<128x128xbf16>, vector<32x128xf32> -> vector<32x128xf32>
    %cst_14 = arith.constant 2.000000e+00 : f32
    %16 = vector.broadcast %cst_14 : f32 to vector<32x128xf32>
    %17 = arith.mulf %16, %15 : vector<32x128xf32>
    %18 = arith.subf %17, %6 : vector<32x128xf32>
    %19 = arith.truncf %13 : vector<32x128xf32> to vector<32x128xbf16>
    %cst_15 = arith.constant dense<0.000000e+00> : vector<32x128xf32>
    %20 = tpu.matmul %19, %3, %cst_15 {dimension_numbers = #tpu.dot_dimension_numbers<[1], [0], [0], [1], [0, 0, 1, 1], [], []>} : vector<32x128xbf16>, vector<128x128xbf16>, vector<32x128xf32> -> vector<32x128xf32>
    %cst_16 = arith.constant 2.000000e+00 : f32
    %21 = vector.broadcast %cst_16 : f32 to vector<32x128xf32>
    %22 = arith.mulf %21, %20 : vector<32x128xf32>
    %23 = arith.subf %22, %9 : vector<32x128xf32>
    %24 = vector.extract_strided_slice %6 {offsets = [0, 0], sizes = [8, 128], strides = [1, 1]} : vector<32x128xf32> to vector<8x128xf32>
    %25 = vector.extract_strided_slice %6 {offsets = [8, 0], sizes = [8, 128], strides = [1, 1]} : vector<32x128xf32> to vector<8x128xf32>
    %26 = vector.extract_strided_slice %6 {offsets = [16, 0], sizes = [8, 128], strides = [1, 1]} : vector<32x128xf32> to vector<8x128xf32>
    %27 = vector.extract_strided_slice %6 {offsets = [24, 0], sizes = [8, 128], strides = [1, 1]} : vector<32x128xf32> to vector<8x128xf32>
    %28 = vector.extract_strided_slice %11 {offsets = [0, 0], sizes = [8, 128], strides = [1, 1]} : vector<32x128xf32> to vector<8x128xf32>
    %29 = vector.extract_strided_slice %11 {offsets = [8, 0], sizes = [8, 128], strides = [1, 1]} : vector<32x128xf32> to vector<8x128xf32>
    %30 = vector.extract_strided_slice %11 {offsets = [16, 0], sizes = [8, 128], strides = [1, 1]} : vector<32x128xf32> to vector<8x128xf32>
    %31 = vector.extract_strided_slice %11 {offsets = [24, 0], sizes = [8, 128], strides = [1, 1]} : vector<32x128xf32> to vector<8x128xf32>
    %32 = vector.extract_strided_slice %18 {offsets = [0, 0], sizes = [8, 128], strides = [1, 1]} : vector<32x128xf32> to vector<8x128xf32>
    %33 = vector.extract_strided_slice %18 {offsets = [8, 0], sizes = [8, 128], strides = [1, 1]} : vector<32x128xf32> to vector<8x128xf32>
    %34 = vector.extract_strided_slice %18 {offsets = [16, 0], sizes = [8, 128], strides = [1, 1]} : vector<32x128xf32> to vector<8x128xf32>
    %35 = vector.extract_strided_slice %18 {offsets = [24, 0], sizes = [8, 128], strides = [1, 1]} : vector<32x128xf32> to vector<8x128xf32>
    %c0_17 = arith.constant 0 : index
    %36 = memref.load %arg4[%c0_17] : memref<4xf32, #tpu.memory_space<smem>>
    %37 = vector.broadcast %36 : f32 to vector<8x128xf32>
    %c0_18 = arith.constant 0 : index
    %38 = memref.load %arg3[%c0_18] : memref<48xf32, #tpu.memory_space<smem>>
    %39 = vector.broadcast %38 : f32 to vector<8x128xf32>
    %40 = arith.mulf %39, %24 : vector<8x128xf32>
    %41 = arith.addf %37, %40 : vector<8x128xf32>
    %c12 = arith.constant 12 : index
    %42 = memref.load %arg3[%c12] : memref<48xf32, #tpu.memory_space<smem>>
    %43 = vector.broadcast %42 : f32 to vector<8x128xf32>
    %44 = arith.mulf %43, %25 : vector<8x128xf32>
    %45 = arith.addf %41, %44 : vector<8x128xf32>
    %c24 = arith.constant 24 : index
    %46 = memref.load %arg3[%c24] : memref<48xf32, #tpu.memory_space<smem>>
    %47 = vector.broadcast %46 : f32 to vector<8x128xf32>
    %48 = arith.mulf %47, %26 : vector<8x128xf32>
    %49 = arith.addf %45, %48 : vector<8x128xf32>
    %c36 = arith.constant 36 : index
    %50 = memref.load %arg3[%c36] : memref<48xf32, #tpu.memory_space<smem>>
    %51 = vector.broadcast %50 : f32 to vector<8x128xf32>
    %52 = arith.mulf %51, %27 : vector<8x128xf32>
    %53 = arith.addf %49, %52 : vector<8x128xf32>
    %c1_19 = arith.constant 1 : index
    %54 = memref.load %arg3[%c1_19] : memref<48xf32, #tpu.memory_space<smem>>
    %55 = vector.broadcast %54 : f32 to vector<8x128xf32>
    %56 = arith.mulf %55, %28 : vector<8x128xf32>
    %57 = arith.addf %53, %56 : vector<8x128xf32>
    %c13 = arith.constant 13 : index
    %58 = memref.load %arg3[%c13] : memref<48xf32, #tpu.memory_space<smem>>
    %59 = vector.broadcast %58 : f32 to vector<8x128xf32>
    %60 = arith.mulf %59, %29 : vector<8x128xf32>
    %61 = arith.addf %57, %60 : vector<8x128xf32>
    %c25 = arith.constant 25 : index
    %62 = memref.load %arg3[%c25] : memref<48xf32, #tpu.memory_space<smem>>
    %63 = vector.broadcast %62 : f32 to vector<8x128xf32>
    %64 = arith.mulf %63, %30 : vector<8x128xf32>
    %65 = arith.addf %61, %64 : vector<8x128xf32>
    %c37 = arith.constant 37 : index
    %66 = memref.load %arg3[%c37] : memref<48xf32, #tpu.memory_space<smem>>
    %67 = vector.broadcast %66 : f32 to vector<8x128xf32>
    %68 = arith.mulf %67, %31 : vector<8x128xf32>
    %69 = arith.addf %65, %68 : vector<8x128xf32>
    %c2 = arith.constant 2 : index
    %70 = memref.load %arg3[%c2] : memref<48xf32, #tpu.memory_space<smem>>
    %71 = vector.broadcast %70 : f32 to vector<8x128xf32>
    %72 = arith.mulf %71, %32 : vector<8x128xf32>
    %73 = arith.addf %69, %72 : vector<8x128xf32>
    %c14 = arith.constant 14 : index
    %74 = memref.load %arg3[%c14] : memref<48xf32, #tpu.memory_space<smem>>
    %75 = vector.broadcast %74 : f32 to vector<8x128xf32>
    %76 = arith.mulf %75, %33 : vector<8x128xf32>
    %77 = arith.addf %73, %76 : vector<8x128xf32>
    %c26 = arith.constant 26 : index
    %78 = memref.load %arg3[%c26] : memref<48xf32, #tpu.memory_space<smem>>
    %79 = vector.broadcast %78 : f32 to vector<8x128xf32>
    %80 = arith.mulf %79, %34 : vector<8x128xf32>
    %81 = arith.addf %77, %80 : vector<8x128xf32>
    %c38 = arith.constant 38 : index
    %82 = memref.load %arg3[%c38] : memref<48xf32, #tpu.memory_space<smem>>
    %83 = vector.broadcast %82 : f32 to vector<8x128xf32>
    %84 = arith.mulf %83, %35 : vector<8x128xf32>
    %85 = arith.addf %81, %84 : vector<8x128xf32>
    %cst_20 = arith.constant 0.000000e+00 : f32
    %86 = vector.broadcast %cst_20 : f32 to vector<8x128xf32>
    %87 = arith.maximumf %85, %86 : vector<8x128xf32>
    %c0_21 = arith.constant 0 : index
    %c0_22 = arith.constant 0 : index
    %c0_23 = arith.constant 0 : index
    %c0_24 = arith.constant 0 : index
    %88 = vector.load %arg5[%c0_21, %c0_22, %c0_23, %c0_24] : memref<2x4x8x128xf32, #tpu.memory_space<vmem>>, vector<1x1x8x128xf32>
    %89 = vector.shape_cast %88 : vector<1x1x8x128xf32> to vector<8x128xf32>
    %90 = vector.shape_cast %87 : vector<8x128xf32> to vector<1x1x8x128xf32>
    tpu.vector_store %arg5[%c0_21, %c0_22, %c0_23, %c0_24], %90 {strides = array<i32>} : memref<2x4x8x128xf32, #tpu.memory_space<vmem>>, vector<1x1x8x128xf32>,
    %c1_25 = arith.constant 1 : index
    %91 = memref.load %arg4[%c1_25] : memref<4xf32, #tpu.memory_space<smem>>
    %92 = vector.broadcast %91 : f32 to vector<8x128xf32>
    %c3 = arith.constant 3 : index
    %93 = memref.load %arg3[%c3] : memref<48xf32, #tpu.memory_space<smem>>
    %94 = vector.broadcast %93 : f32 to vector<8x128xf32>
    %95 = arith.mulf %94, %24 : vector<8x128xf32>
    %96 = arith.addf %92, %95 : vector<8x128xf32>
    %c15 = arith.constant 15 : index
    %97 = memref.load %arg3[%c15] : memref<48xf32, #tpu.memory_space<smem>>
    %98 = vector.broadcast %97 : f32 to vector<8x128xf32>
    %99 = arith.mulf %98, %25 : vector<8x128xf32>
    %100 = arith.addf %96, %99 : vector<8x128xf32>
    %c27 = arith.constant 27 : index
    %101 = memref.load %arg3[%c27] : memref<48xf32, #tpu.memory_space<smem>>
    %102 = vector.broadcast %101 : f32 to vector<8x128xf32>
    %103 = arith.mulf %102, %26 : vector<8x128xf32>
    %104 = arith.addf %100, %103 : vector<8x128xf32>
    %c39 = arith.constant 39 : index
    %105 = memref.load %arg3[%c39] : memref<48xf32, #tpu.memory_space<smem>>
    %106 = vector.broadcast %105 : f32 to vector<8x128xf32>
    %107 = arith.mulf %106, %27 : vector<8x128xf32>
    %108 = arith.addf %104, %107 : vector<8x128xf32>
    %c4 = arith.constant 4 : index
    %109 = memref.load %arg3[%c4] : memref<48xf32, #tpu.memory_space<smem>>
    %110 = vector.broadcast %109 : f32 to vector<8x128xf32>
    %111 = arith.mulf %110, %28 : vector<8x128xf32>
    %112 = arith.addf %108, %111 : vector<8x128xf32>
    %c16 = arith.constant 16 : index
    %113 = memref.load %arg3[%c16] : memref<48xf32, #tpu.memory_space<smem>>
    %114 = vector.broadcast %113 : f32 to vector<8x128xf32>
    %115 = arith.mulf %114, %29 : vector<8x128xf32>
    %116 = arith.addf %112, %115 : vector<8x128xf32>
    %c28 = arith.constant 28 : index
    %117 = memref.load %arg3[%c28] : memref<48xf32, #tpu.memory_space<smem>>
    %118 = vector.broadcast %117 : f32 to vector<8x128xf32>
    %119 = arith.mulf %118, %30 : vector<8x128xf32>
    %120 = arith.addf %116, %119 : vector<8x128xf32>
    %c40 = arith.constant 40 : index
    %121 = memref.load %arg3[%c40] : memref<48xf32, #tpu.memory_space<smem>>
    %122 = vector.broadcast %121 : f32 to vector<8x128xf32>
    %123 = arith.mulf %122, %31 : vector<8x128xf32>
    %124 = arith.addf %120, %123 : vector<8x128xf32>
    %c5 = arith.constant 5 : index
    %125 = memref.load %arg3[%c5] : memref<48xf32, #tpu.memory_space<smem>>
    %126 = vector.broadcast %125 : f32 to vector<8x128xf32>
    %127 = arith.mulf %126, %32 : vector<8x128xf32>
    %128 = arith.addf %124, %127 : vector<8x128xf32>
    %c17 = arith.constant 17 : index
    %129 = memref.load %arg3[%c17] : memref<48xf32, #tpu.memory_space<smem>>
    %130 = vector.broadcast %129 : f32 to vector<8x128xf32>
    %131 = arith.mulf %130, %33 : vector<8x128xf32>
    %132 = arith.addf %128, %131 : vector<8x128xf32>
    %c29 = arith.constant 29 : index
    %133 = memref.load %arg3[%c29] : memref<48xf32, #tpu.memory_space<smem>>
    %134 = vector.broadcast %133 : f32 to vector<8x128xf32>
    %135 = arith.mulf %134, %34 : vector<8x128xf32>
    %136 = arith.addf %132, %135 : vector<8x128xf32>
    %c41 = arith.constant 41 : index
    %137 = memref.load %arg3[%c41] : memref<48xf32, #tpu.memory_space<smem>>
    %138 = vector.broadcast %137 : f32 to vector<8x128xf32>
    %139 = arith.mulf %138, %35 : vector<8x128xf32>
    %140 = arith.addf %136, %139 : vector<8x128xf32>
    %cst_26 = arith.constant 0.000000e+00 : f32
    %141 = vector.broadcast %cst_26 : f32 to vector<8x128xf32>
    %142 = arith.maximumf %140, %141 : vector<8x128xf32>
    %c0_27 = arith.constant 0 : index
    %c1_28 = arith.constant 1 : index
    %c0_29 = arith.constant 0 : index
    %c0_30 = arith.constant 0 : index
    %143 = vector.load %arg5[%c0_27, %c1_28, %c0_29, %c0_30] : memref<2x4x8x128xf32, #tpu.memory_space<vmem>>, vector<1x1x8x128xf32>
    %144 = vector.shape_cast %143 : vector<1x1x8x128xf32> to vector<8x128xf32>
    %145 = vector.shape_cast %142 : vector<8x128xf32> to vector<1x1x8x128xf32>
    tpu.vector_store %arg5[%c0_27, %c1_28, %c0_29, %c0_30], %145 {strides = array<i32>} : memref<2x4x8x128xf32, #tpu.memory_space<vmem>>, vector<1x1x8x128xf32>,
    %c2_31 = arith.constant 2 : index
    %146 = memref.load %arg4[%c2_31] : memref<4xf32, #tpu.memory_space<smem>>
    %147 = vector.broadcast %146 : f32 to vector<8x128xf32>
    %c6 = arith.constant 6 : index
    %148 = memref.load %arg3[%c6] : memref<48xf32, #tpu.memory_space<smem>>
    %149 = vector.broadcast %148 : f32 to vector<8x128xf32>
    %150 = arith.mulf %149, %24 : vector<8x128xf32>
    %151 = arith.addf %147, %150 : vector<8x128xf32>
    %c18 = arith.constant 18 : index
    %152 = memref.load %arg3[%c18] : memref<48xf32, #tpu.memory_space<smem>>
    %153 = vector.broadcast %152 : f32 to vector<8x128xf32>
    %154 = arith.mulf %153, %25 : vector<8x128xf32>
    %155 = arith.addf %151, %154 : vector<8x128xf32>
    %c30 = arith.constant 30 : index
    %156 = memref.load %arg3[%c30] : memref<48xf32, #tpu.memory_space<smem>>
    %157 = vector.broadcast %156 : f32 to vector<8x128xf32>
    %158 = arith.mulf %157, %26 : vector<8x128xf32>
    %159 = arith.addf %155, %158 : vector<8x128xf32>
    %c42 = arith.constant 42 : index
    %160 = memref.load %arg3[%c42] : memref<48xf32, #tpu.memory_space<smem>>
    %161 = vector.broadcast %160 : f32 to vector<8x128xf32>
    %162 = arith.mulf %161, %27 : vector<8x128xf32>
    %163 = arith.addf %159, %162 : vector<8x128xf32>
    %c7 = arith.constant 7 : index
    %164 = memref.load %arg3[%c7] : memref<48xf32, #tpu.memory_space<smem>>
    %165 = vector.broadcast %164 : f32 to vector<8x128xf32>
    %166 = arith.mulf %165, %28 : vector<8x128xf32>
    %167 = arith.addf %163, %166 : vector<8x128xf32>
    %c19 = arith.constant 19 : index
    %168 = memref.load %arg3[%c19] : memref<48xf32, #tpu.memory_space<smem>>
    %169 = vector.broadcast %168 : f32 to vector<8x128xf32>
    %170 = arith.mulf %169, %29 : vector<8x128xf32>
    %171 = arith.addf %167, %170 : vector<8x128xf32>
    %c31 = arith.constant 31 : index
    %172 = memref.load %arg3[%c31] : memref<48xf32, #tpu.memory_space<smem>>
    %173 = vector.broadcast %172 : f32 to vector<8x128xf32>
    %174 = arith.mulf %173, %30 : vector<8x128xf32>
    %175 = arith.addf %171, %174 : vector<8x128xf32>
    %c43 = arith.constant 43 : index
    %176 = memref.load %arg3[%c43] : memref<48xf32, #tpu.memory_space<smem>>
    %177 = vector.broadcast %176 : f32 to vector<8x128xf32>
    %178 = arith.mulf %177, %31 : vector<8x128xf32>
    %179 = arith.addf %175, %178 : vector<8x128xf32>
    %c8 = arith.constant 8 : index
    %180 = memref.load %arg3[%c8] : memref<48xf32, #tpu.memory_space<smem>>
    %181 = vector.broadcast %180 : f32 to vector<8x128xf32>
    %182 = arith.mulf %181, %32 : vector<8x128xf32>
    %183 = arith.addf %179, %182 : vector<8x128xf32>
    %c20 = arith.constant 20 : index
    %184 = memref.load %arg3[%c20] : memref<48xf32, #tpu.memory_space<smem>>
    %185 = vector.broadcast %184 : f32 to vector<8x128xf32>
    %186 = arith.mulf %185, %33 : vector<8x128xf32>
    %187 = arith.addf %183, %186 : vector<8x128xf32>
    %c32 = arith.constant 32 : index
    %188 = memref.load %arg3[%c32] : memref<48xf32, #tpu.memory_space<smem>>
    %189 = vector.broadcast %188 : f32 to vector<8x128xf32>
    %190 = arith.mulf %189, %34 : vector<8x128xf32>
    %191 = arith.addf %187, %190 : vector<8x128xf32>
    %c44 = arith.constant 44 : index
    %192 = memref.load %arg3[%c44] : memref<48xf32, #tpu.memory_space<smem>>
    %193 = vector.broadcast %192 : f32 to vector<8x128xf32>
    %194 = arith.mulf %193, %35 : vector<8x128xf32>
    %195 = arith.addf %191, %194 : vector<8x128xf32>
    %cst_32 = arith.constant 0.000000e+00 : f32
    %196 = vector.broadcast %cst_32 : f32 to vector<8x128xf32>
    %197 = arith.maximumf %195, %196 : vector<8x128xf32>
    %c0_33 = arith.constant 0 : index
    %c2_34 = arith.constant 2 : index
    %c0_35 = arith.constant 0 : index
    %c0_36 = arith.constant 0 : index
    %198 = vector.load %arg5[%c0_33, %c2_34, %c0_35, %c0_36] : memref<2x4x8x128xf32, #tpu.memory_space<vmem>>, vector<1x1x8x128xf32>
    %199 = vector.shape_cast %198 : vector<1x1x8x128xf32> to vector<8x128xf32>
    %200 = vector.shape_cast %197 : vector<8x128xf32> to vector<1x1x8x128xf32>
    tpu.vector_store %arg5[%c0_33, %c2_34, %c0_35, %c0_36], %200 {strides = array<i32>} : memref<2x4x8x128xf32, #tpu.memory_space<vmem>>, vector<1x1x8x128xf32>,
    %c3_37 = arith.constant 3 : index
    %201 = memref.load %arg4[%c3_37] : memref<4xf32, #tpu.memory_space<smem>>
    %202 = vector.broadcast %201 : f32 to vector<8x128xf32>
    %c9 = arith.constant 9 : index
    %203 = memref.load %arg3[%c9] : memref<48xf32, #tpu.memory_space<smem>>
    %204 = vector.broadcast %203 : f32 to vector<8x128xf32>
    %205 = arith.mulf %204, %24 : vector<8x128xf32>
    %206 = arith.addf %202, %205 : vector<8x128xf32>
    %c21 = arith.constant 21 : index
    %207 = memref.load %arg3[%c21] : memref<48xf32, #tpu.memory_space<smem>>
    %208 = vector.broadcast %207 : f32 to vector<8x128xf32>
    %209 = arith.mulf %208, %25 : vector<8x128xf32>
    %210 = arith.addf %206, %209 : vector<8x128xf32>
    %c33 = arith.constant 33 : index
    %211 = memref.load %arg3[%c33] : memref<48xf32, #tpu.memory_space<smem>>
    %212 = vector.broadcast %211 : f32 to vector<8x128xf32>
    %213 = arith.mulf %212, %26 : vector<8x128xf32>
    %214 = arith.addf %210, %213 : vector<8x128xf32>
    %c45 = arith.constant 45 : index
    %215 = memref.load %arg3[%c45] : memref<48xf32, #tpu.memory_space<smem>>
    %216 = vector.broadcast %215 : f32 to vector<8x128xf32>
    %217 = arith.mulf %216, %27 : vector<8x128xf32>
    %218 = arith.addf %214, %217 : vector<8x128xf32>
    %c10 = arith.constant 10 : index
    %219 = memref.load %arg3[%c10] : memref<48xf32, #tpu.memory_space<smem>>
    %220 = vector.broadcast %219 : f32 to vector<8x128xf32>
    %221 = arith.mulf %220, %28 : vector<8x128xf32>
    %222 = arith.addf %218, %221 : vector<8x128xf32>
    %c22 = arith.constant 22 : index
    %223 = memref.load %arg3[%c22] : memref<48xf32, #tpu.memory_space<smem>>
    %224 = vector.broadcast %223 : f32 to vector<8x128xf32>
    %225 = arith.mulf %224, %29 : vector<8x128xf32>
    %226 = arith.addf %222, %225 : vector<8x128xf32>
    %c34 = arith.constant 34 : index
    %227 = memref.load %arg3[%c34] : memref<48xf32, #tpu.memory_space<smem>>
    %228 = vector.broadcast %227 : f32 to vector<8x128xf32>
    %229 = arith.mulf %228, %30 : vector<8x128xf32>
    %230 = arith.addf %226, %229 : vector<8x128xf32>
    %c46 = arith.constant 46 : index
    %231 = memref.load %arg3[%c46] : memref<48xf32, #tpu.memory_space<smem>>
    %232 = vector.broadcast %231 : f32 to vector<8x128xf32>
    %233 = arith.mulf %232, %31 : vector<8x128xf32>
    %234 = arith.addf %230, %233 : vector<8x128xf32>
    %c11 = arith.constant 11 : index
    %235 = memref.load %arg3[%c11] : memref<48xf32, #tpu.memory_space<smem>>
    %236 = vector.broadcast %235 : f32 to vector<8x128xf32>
    %237 = arith.mulf %236, %32 : vector<8x128xf32>
    %238 = arith.addf %234, %237 : vector<8x128xf32>
    %c23 = arith.constant 23 : index
    %239 = memref.load %arg3[%c23] : memref<48xf32, #tpu.memory_space<smem>>
    %240 = vector.broadcast %239 : f32 to vector<8x128xf32>
    %241 = arith.mulf %240, %33 : vector<8x128xf32>
    %242 = arith.addf %238, %241 : vector<8x128xf32>
    %c35 = arith.constant 35 : index
    %243 = memref.load %arg3[%c35] : memref<48xf32, #tpu.memory_space<smem>>
    %244 = vector.broadcast %243 : f32 to vector<8x128xf32>
    %245 = arith.mulf %244, %34 : vector<8x128xf32>
    %246 = arith.addf %242, %245 : vector<8x128xf32>
    %c47 = arith.constant 47 : index
    %247 = memref.load %arg3[%c47] : memref<48xf32, #tpu.memory_space<smem>>
    %248 = vector.broadcast %247 : f32 to vector<8x128xf32>
    %249 = arith.mulf %248, %35 : vector<8x128xf32>
    %250 = arith.addf %246, %249 : vector<8x128xf32>
    %cst_38 = arith.constant 0.000000e+00 : f32
    %251 = vector.broadcast %cst_38 : f32 to vector<8x128xf32>
    %252 = arith.maximumf %250, %251 : vector<8x128xf32>
    %c0_39 = arith.constant 0 : index
    %c3_40 = arith.constant 3 : index
    %c0_41 = arith.constant 0 : index
    %c0_42 = arith.constant 0 : index
    %253 = vector.load %arg5[%c0_39, %c3_40, %c0_41, %c0_42] : memref<2x4x8x128xf32, #tpu.memory_space<vmem>>, vector<1x1x8x128xf32>
    %254 = vector.shape_cast %253 : vector<1x1x8x128xf32> to vector<8x128xf32>
    %255 = vector.shape_cast %252 : vector<8x128xf32> to vector<1x1x8x128xf32>
    tpu.vector_store %arg5[%c0_39, %c3_40, %c0_41, %c0_42], %255 {strides = array<i32>} : memref<2x4x8x128xf32, #tpu.memory_space<vmem>>, vector<1x1x8x128xf32>,
    %256 = vector.extract_strided_slice %9 {offsets = [0, 0], sizes = [8, 128], strides = [1, 1]} : vector<32x128xf32> to vector<8x128xf32>
    %257 = vector.extract_strided_slice %9 {offsets = [8, 0], sizes = [8, 128], strides = [1, 1]} : vector<32x128xf32> to vector<8x128xf32>
    %258 = vector.extract_strided_slice %9 {offsets = [16, 0], sizes = [8, 128], strides = [1, 1]} : vector<32x128xf32> to vector<8x128xf32>
    %259 = vector.extract_strided_slice %9 {offsets = [24, 0], sizes = [8, 128], strides = [1, 1]} : vector<32x128xf32> to vector<8x128xf32>
    %260 = vector.extract_strided_slice %13 {offsets = [0, 0], sizes = [8, 128], strides = [1, 1]} : vector<32x128xf32> to vector<8x128xf32>
    %261 = vector.extract_strided_slice %13 {offsets = [8, 0], sizes = [8, 128], strides = [1, 1]} : vector<32x128xf32> to vector<8x128xf32>
    %262 = vector.extract_strided_slice %13 {offsets = [16, 0], sizes = [8, 128], strides = [1, 1]} : vector<32x128xf32> to vector<8x128xf32>
    %263 = vector.extract_strided_slice %13 {offsets = [24, 0], sizes = [8, 128], strides = [1, 1]} : vector<32x128xf32> to vector<8x128xf32>
    %264 = vector.extract_strided_slice %23 {offsets = [0, 0], sizes = [8, 128], strides = [1, 1]} : vector<32x128xf32> to vector<8x128xf32>
    %265 = vector.extract_strided_slice %23 {offsets = [8, 0], sizes = [8, 128], strides = [1, 1]} : vector<32x128xf32> to vector<8x128xf32>
    %266 = vector.extract_strided_slice %23 {offsets = [16, 0], sizes = [8, 128], strides = [1, 1]} : vector<32x128xf32> to vector<8x128xf32>
    %267 = vector.extract_strided_slice %23 {offsets = [24, 0], sizes = [8, 128], strides = [1, 1]} : vector<32x128xf32> to vector<8x128xf32>
    %c0_43 = arith.constant 0 : index
    %268 = memref.load %arg4[%c0_43] : memref<4xf32, #tpu.memory_space<smem>>
    %269 = vector.broadcast %268 : f32 to vector<8x128xf32>
    %c0_44 = arith.constant 0 : index
    %270 = memref.load %arg3[%c0_44] : memref<48xf32, #tpu.memory_space<smem>>
    %271 = vector.broadcast %270 : f32 to vector<8x128xf32>
    %272 = arith.mulf %271, %256 : vector<8x128xf32>
    %273 = arith.addf %269, %272 : vector<8x128xf32>
    %c12_45 = arith.constant 12 : index
    %274 = memref.load %arg3[%c12_45] : memref<48xf32, #tpu.memory_space<smem>>
    %275 = vector.broadcast %274 : f32 to vector<8x128xf32>
    %276 = arith.mulf %275, %257 : vector<8x128xf32>
    %277 = arith.addf %273, %276 : vector<8x128xf32>
    %c24_46 = arith.constant 24 : index
    %278 = memref.load %arg3[%c24_46] : memref<48xf32, #tpu.memory_space<smem>>
    %279 = vector.broadcast %278 : f32 to vector<8x128xf32>
    %280 = arith.mulf %279, %258 : vector<8x128xf32>
    %281 = arith.addf %277, %280 : vector<8x128xf32>
    %c36_47 = arith.constant 36 : index
    %282 = memref.load %arg3[%c36_47] : memref<48xf32, #tpu.memory_space<smem>>
    %283 = vector.broadcast %282 : f32 to vector<8x128xf32>
    %284 = arith.mulf %283, %259 : vector<8x128xf32>
    %285 = arith.addf %281, %284 : vector<8x128xf32>
    %c1_48 = arith.constant 1 : index
    %286 = memref.load %arg3[%c1_48] : memref<48xf32, #tpu.memory_space<smem>>
    %287 = vector.broadcast %286 : f32 to vector<8x128xf32>
    %288 = arith.mulf %287, %260 : vector<8x128xf32>
    %289 = arith.addf %285, %288 : vector<8x128xf32>
    %c13_49 = arith.constant 13 : index
    %290 = memref.load %arg3[%c13_49] : memref<48xf32, #tpu.memory_space<smem>>
    %291 = vector.broadcast %290 : f32 to vector<8x128xf32>
    %292 = arith.mulf %291, %261 : vector<8x128xf32>
    %293 = arith.addf %289, %292 : vector<8x128xf32>
    %c25_50 = arith.constant 25 : index
    %294 = memref.load %arg3[%c25_50] : memref<48xf32, #tpu.memory_space<smem>>
    %295 = vector.broadcast %294 : f32 to vector<8x128xf32>
    %296 = arith.mulf %295, %262 : vector<8x128xf32>
    %297 = arith.addf %293, %296 : vector<8x128xf32>
    %c37_51 = arith.constant 37 : index
    %298 = memref.load %arg3[%c37_51] : memref<48xf32, #tpu.memory_space<smem>>
    %299 = vector.broadcast %298 : f32 to vector<8x128xf32>
    %300 = arith.mulf %299, %263 : vector<8x128xf32>
    %301 = arith.addf %297, %300 : vector<8x128xf32>
    %c2_52 = arith.constant 2 : index
    %302 = memref.load %arg3[%c2_52] : memref<48xf32, #tpu.memory_space<smem>>
    %303 = vector.broadcast %302 : f32 to vector<8x128xf32>
    %304 = arith.mulf %303, %264 : vector<8x128xf32>
    %305 = arith.addf %301, %304 : vector<8x128xf32>
    %c14_53 = arith.constant 14 : index
    %306 = memref.load %arg3[%c14_53] : memref<48xf32, #tpu.memory_space<smem>>
    %307 = vector.broadcast %306 : f32 to vector<8x128xf32>
    %308 = arith.mulf %307, %265 : vector<8x128xf32>
    %309 = arith.addf %305, %308 : vector<8x128xf32>
    %c26_54 = arith.constant 26 : index
    %310 = memref.load %arg3[%c26_54] : memref<48xf32, #tpu.memory_space<smem>>
    %311 = vector.broadcast %310 : f32 to vector<8x128xf32>
    %312 = arith.mulf %311, %266 : vector<8x128xf32>
    %313 = arith.addf %309, %312 : vector<8x128xf32>
    %c38_55 = arith.constant 38 : index
    %314 = memref.load %arg3[%c38_55] : memref<48xf32, #tpu.memory_space<smem>>
    %315 = vector.broadcast %314 : f32 to vector<8x128xf32>
    %316 = arith.mulf %315, %267 : vector<8x128xf32>
    %317 = arith.addf %313, %316 : vector<8x128xf32>
    %cst_56 = arith.constant 0.000000e+00 : f32
    %318 = vector.broadcast %cst_56 : f32 to vector<8x128xf32>
    %319 = arith.maximumf %317, %318 : vector<8x128xf32>
    %c1_57 = arith.constant 1 : index
    %c0_58 = arith.constant 0 : index
    %c0_59 = arith.constant 0 : index
    %c0_60 = arith.constant 0 : index
    %320 = vector.load %arg5[%c1_57, %c0_58, %c0_59, %c0_60] : memref<2x4x8x128xf32, #tpu.memory_space<vmem>>, vector<1x1x8x128xf32>
    %321 = vector.shape_cast %320 : vector<1x1x8x128xf32> to vector<8x128xf32>
    %322 = vector.shape_cast %319 : vector<8x128xf32> to vector<1x1x8x128xf32>
    tpu.vector_store %arg5[%c1_57, %c0_58, %c0_59, %c0_60], %322 {strides = array<i32>} : memref<2x4x8x128xf32, #tpu.memory_space<vmem>>, vector<1x1x8x128xf32>,
    %c1_61 = arith.constant 1 : index
    %323 = memref.load %arg4[%c1_61] : memref<4xf32, #tpu.memory_space<smem>>
    %324 = vector.broadcast %323 : f32 to vector<8x128xf32>
    %c3_62 = arith.constant 3 : index
    %325 = memref.load %arg3[%c3_62] : memref<48xf32, #tpu.memory_space<smem>>
    %326 = vector.broadcast %325 : f32 to vector<8x128xf32>
    %327 = arith.mulf %326, %256 : vector<8x128xf32>
    %328 = arith.addf %324, %327 : vector<8x128xf32>
    %c15_63 = arith.constant 15 : index
    %329 = memref.load %arg3[%c15_63] : memref<48xf32, #tpu.memory_space<smem>>
    %330 = vector.broadcast %329 : f32 to vector<8x128xf32>
    %331 = arith.mulf %330, %257 : vector<8x128xf32>
    %332 = arith.addf %328, %331 : vector<8x128xf32>
    %c27_64 = arith.constant 27 : index
    %333 = memref.load %arg3[%c27_64] : memref<48xf32, #tpu.memory_space<smem>>
    %334 = vector.broadcast %333 : f32 to vector<8x128xf32>
    %335 = arith.mulf %334, %258 : vector<8x128xf32>
    %336 = arith.addf %332, %335 : vector<8x128xf32>
    %c39_65 = arith.constant 39 : index
    %337 = memref.load %arg3[%c39_65] : memref<48xf32, #tpu.memory_space<smem>>
    %338 = vector.broadcast %337 : f32 to vector<8x128xf32>
    %339 = arith.mulf %338, %259 : vector<8x128xf32>
    %340 = arith.addf %336, %339 : vector<8x128xf32>
    %c4_66 = arith.constant 4 : index
    %341 = memref.load %arg3[%c4_66] : memref<48xf32, #tpu.memory_space<smem>>
    %342 = vector.broadcast %341 : f32 to vector<8x128xf32>
    %343 = arith.mulf %342, %260 : vector<8x128xf32>
    %344 = arith.addf %340, %343 : vector<8x128xf32>
    %c16_67 = arith.constant 16 : index
    %345 = memref.load %arg3[%c16_67] : memref<48xf32, #tpu.memory_space<smem>>
    %346 = vector.broadcast %345 : f32 to vector<8x128xf32>
    %347 = arith.mulf %346, %261 : vector<8x128xf32>
    %348 = arith.addf %344, %347 : vector<8x128xf32>
    %c28_68 = arith.constant 28 : index
    %349 = memref.load %arg3[%c28_68] : memref<48xf32, #tpu.memory_space<smem>>
    %350 = vector.broadcast %349 : f32 to vector<8x128xf32>
    %351 = arith.mulf %350, %262 : vector<8x128xf32>
    %352 = arith.addf %348, %351 : vector<8x128xf32>
    %c40_69 = arith.constant 40 : index
    %353 = memref.load %arg3[%c40_69] : memref<48xf32, #tpu.memory_space<smem>>
    %354 = vector.broadcast %353 : f32 to vector<8x128xf32>
    %355 = arith.mulf %354, %263 : vector<8x128xf32>
    %356 = arith.addf %352, %355 : vector<8x128xf32>
    %c5_70 = arith.constant 5 : index
    %357 = memref.load %arg3[%c5_70] : memref<48xf32, #tpu.memory_space<smem>>
    %358 = vector.broadcast %357 : f32 to vector<8x128xf32>
    %359 = arith.mulf %358, %264 : vector<8x128xf32>
    %360 = arith.addf %356, %359 : vector<8x128xf32>
    %c17_71 = arith.constant 17 : index
    %361 = memref.load %arg3[%c17_71] : memref<48xf32, #tpu.memory_space<smem>>
    %362 = vector.broadcast %361 : f32 to vector<8x128xf32>
    %363 = arith.mulf %362, %265 : vector<8x128xf32>
    %364 = arith.addf %360, %363 : vector<8x128xf32>
    %c29_72 = arith.constant 29 : index
    %365 = memref.load %arg3[%c29_72] : memref<48xf32, #tpu.memory_space<smem>>
    %366 = vector.broadcast %365 : f32 to vector<8x128xf32>
    %367 = arith.mulf %366, %266 : vector<8x128xf32>
    %368 = arith.addf %364, %367 : vector<8x128xf32>
    %c41_73 = arith.constant 41 : index
    %369 = memref.load %arg3[%c41_73] : memref<48xf32, #tpu.memory_space<smem>>
    %370 = vector.broadcast %369 : f32 to vector<8x128xf32>
    %371 = arith.mulf %370, %267 : vector<8x128xf32>
    %372 = arith.addf %368, %371 : vector<8x128xf32>
    %cst_74 = arith.constant 0.000000e+00 : f32
    %373 = vector.broadcast %cst_74 : f32 to vector<8x128xf32>
    %374 = arith.maximumf %372, %373 : vector<8x128xf32>
    %c1_75 = arith.constant 1 : index
    %c1_76 = arith.constant 1 : index
    %c0_77 = arith.constant 0 : index
    %c0_78 = arith.constant 0 : index
    %375 = vector.load %arg5[%c1_75, %c1_76, %c0_77, %c0_78] : memref<2x4x8x128xf32, #tpu.memory_space<vmem>>, vector<1x1x8x128xf32>
    %376 = vector.shape_cast %375 : vector<1x1x8x128xf32> to vector<8x128xf32>
    %377 = vector.shape_cast %374 : vector<8x128xf32> to vector<1x1x8x128xf32>
    tpu.vector_store %arg5[%c1_75, %c1_76, %c0_77, %c0_78], %377 {strides = array<i32>} : memref<2x4x8x128xf32, #tpu.memory_space<vmem>>, vector<1x1x8x128xf32>,
    %c2_79 = arith.constant 2 : index
    %378 = memref.load %arg4[%c2_79] : memref<4xf32, #tpu.memory_space<smem>>
    %379 = vector.broadcast %378 : f32 to vector<8x128xf32>
    %c6_80 = arith.constant 6 : index
    %380 = memref.load %arg3[%c6_80] : memref<48xf32, #tpu.memory_space<smem>>
    %381 = vector.broadcast %380 : f32 to vector<8x128xf32>
    %382 = arith.mulf %381, %256 : vector<8x128xf32>
    %383 = arith.addf %379, %382 : vector<8x128xf32>
    %c18_81 = arith.constant 18 : index
    %384 = memref.load %arg3[%c18_81] : memref<48xf32, #tpu.memory_space<smem>>
    %385 = vector.broadcast %384 : f32 to vector<8x128xf32>
    %386 = arith.mulf %385, %257 : vector<8x128xf32>
    %387 = arith.addf %383, %386 : vector<8x128xf32>
    %c30_82 = arith.constant 30 : index
    %388 = memref.load %arg3[%c30_82] : memref<48xf32, #tpu.memory_space<smem>>
    %389 = vector.broadcast %388 : f32 to vector<8x128xf32>
    %390 = arith.mulf %389, %258 : vector<8x128xf32>
    %391 = arith.addf %387, %390 : vector<8x128xf32>
    %c42_83 = arith.constant 42 : index
    %392 = memref.load %arg3[%c42_83] : memref<48xf32, #tpu.memory_space<smem>>
    %393 = vector.broadcast %392 : f32 to vector<8x128xf32>
    %394 = arith.mulf %393, %259 : vector<8x128xf32>
    %395 = arith.addf %391, %394 : vector<8x128xf32>
    %c7_84 = arith.constant 7 : index
    %396 = memref.load %arg3[%c7_84] : memref<48xf32, #tpu.memory_space<smem>>
    %397 = vector.broadcast %396 : f32 to vector<8x128xf32>
    %398 = arith.mulf %397, %260 : vector<8x128xf32>
    %399 = arith.addf %395, %398 : vector<8x128xf32>
    %c19_85 = arith.constant 19 : index
    %400 = memref.load %arg3[%c19_85] : memref<48xf32, #tpu.memory_space<smem>>
    %401 = vector.broadcast %400 : f32 to vector<8x128xf32>
    %402 = arith.mulf %401, %261 : vector<8x128xf32>
    %403 = arith.addf %399, %402 : vector<8x128xf32>
    %c31_86 = arith.constant 31 : index
    %404 = memref.load %arg3[%c31_86] : memref<48xf32, #tpu.memory_space<smem>>
    %405 = vector.broadcast %404 : f32 to vector<8x128xf32>
    %406 = arith.mulf %405, %262 : vector<8x128xf32>
    %407 = arith.addf %403, %406 : vector<8x128xf32>
    %c43_87 = arith.constant 43 : index
    %408 = memref.load %arg3[%c43_87] : memref<48xf32, #tpu.memory_space<smem>>
    %409 = vector.broadcast %408 : f32 to vector<8x128xf32>
    %410 = arith.mulf %409, %263 : vector<8x128xf32>
    %411 = arith.addf %407, %410 : vector<8x128xf32>
    %c8_88 = arith.constant 8 : index
    %412 = memref.load %arg3[%c8_88] : memref<48xf32, #tpu.memory_space<smem>>
    %413 = vector.broadcast %412 : f32 to vector<8x128xf32>
    %414 = arith.mulf %413, %264 : vector<8x128xf32>
    %415 = arith.addf %411, %414 : vector<8x128xf32>
    %c20_89 = arith.constant 20 : index
    %416 = memref.load %arg3[%c20_89] : memref<48xf32, #tpu.memory_space<smem>>
    %417 = vector.broadcast %416 : f32 to vector<8x128xf32>
    %418 = arith.mulf %417, %265 : vector<8x128xf32>
    %419 = arith.addf %415, %418 : vector<8x128xf32>
    %c32_90 = arith.constant 32 : index
    %420 = memref.load %arg3[%c32_90] : memref<48xf32, #tpu.memory_space<smem>>
    %421 = vector.broadcast %420 : f32 to vector<8x128xf32>
    %422 = arith.mulf %421, %266 : vector<8x128xf32>
    %423 = arith.addf %419, %422 : vector<8x128xf32>
    %c44_91 = arith.constant 44 : index
    %424 = memref.load %arg3[%c44_91] : memref<48xf32, #tpu.memory_space<smem>>
    %425 = vector.broadcast %424 : f32 to vector<8x128xf32>
    %426 = arith.mulf %425, %267 : vector<8x128xf32>
    %427 = arith.addf %423, %426 : vector<8x128xf32>
    %cst_92 = arith.constant 0.000000e+00 : f32
    %428 = vector.broadcast %cst_92 : f32 to vector<8x128xf32>
    %429 = arith.maximumf %427, %428 : vector<8x128xf32>
    %c1_93 = arith.constant 1 : index
    %c2_94 = arith.constant 2 : index
    %c0_95 = arith.constant 0 : index
    %c0_96 = arith.constant 0 : index
    %430 = vector.load %arg5[%c1_93, %c2_94, %c0_95, %c0_96] : memref<2x4x8x128xf32, #tpu.memory_space<vmem>>, vector<1x1x8x128xf32>
    %431 = vector.shape_cast %430 : vector<1x1x8x128xf32> to vector<8x128xf32>
    %432 = vector.shape_cast %429 : vector<8x128xf32> to vector<1x1x8x128xf32>
    tpu.vector_store %arg5[%c1_93, %c2_94, %c0_95, %c0_96], %432 {strides = array<i32>} : memref<2x4x8x128xf32, #tpu.memory_space<vmem>>, vector<1x1x8x128xf32>,
    %c3_97 = arith.constant 3 : index
    %433 = memref.load %arg4[%c3_97] : memref<4xf32, #tpu.memory_space<smem>>
    %434 = vector.broadcast %433 : f32 to vector<8x128xf32>
    %c9_98 = arith.constant 9 : index
    %435 = memref.load %arg3[%c9_98] : memref<48xf32, #tpu.memory_space<smem>>
    %436 = vector.broadcast %435 : f32 to vector<8x128xf32>
    %437 = arith.mulf %436, %256 : vector<8x128xf32>
    %438 = arith.addf %434, %437 : vector<8x128xf32>
    %c21_99 = arith.constant 21 : index
    %439 = memref.load %arg3[%c21_99] : memref<48xf32, #tpu.memory_space<smem>>
    %440 = vector.broadcast %439 : f32 to vector<8x128xf32>
    %441 = arith.mulf %440, %257 : vector<8x128xf32>
    %442 = arith.addf %438, %441 : vector<8x128xf32>
    %c33_100 = arith.constant 33 : index
    %443 = memref.load %arg3[%c33_100] : memref<48xf32, #tpu.memory_space<smem>>
    %444 = vector.broadcast %443 : f32 to vector<8x128xf32>
    %445 = arith.mulf %444, %258 : vector<8x128xf32>
    %446 = arith.addf %442, %445 : vector<8x128xf32>
    %c45_101 = arith.constant 45 : index
    %447 = memref.load %arg3[%c45_101] : memref<48xf32, #tpu.memory_space<smem>>
    %448 = vector.broadcast %447 : f32 to vector<8x128xf32>
    %449 = arith.mulf %448, %259 : vector<8x128xf32>
    %450 = arith.addf %446, %449 : vector<8x128xf32>
    %c10_102 = arith.constant 10 : index
    %451 = memref.load %arg3[%c10_102] : memref<48xf32, #tpu.memory_space<smem>>
    %452 = vector.broadcast %451 : f32 to vector<8x128xf32>
    %453 = arith.mulf %452, %260 : vector<8x128xf32>
    %454 = arith.addf %450, %453 : vector<8x128xf32>
    %c22_103 = arith.constant 22 : index
    %455 = memref.load %arg3[%c22_103] : memref<48xf32, #tpu.memory_space<smem>>
    %456 = vector.broadcast %455 : f32 to vector<8x128xf32>
    %457 = arith.mulf %456, %261 : vector<8x128xf32>
    %458 = arith.addf %454, %457 : vector<8x128xf32>
    %c34_104 = arith.constant 34 : index
    %459 = memref.load %arg3[%c34_104] : memref<48xf32, #tpu.memory_space<smem>>
    %460 = vector.broadcast %459 : f32 to vector<8x128xf32>
    %461 = arith.mulf %460, %262 : vector<8x128xf32>
    %462 = arith.addf %458, %461 : vector<8x128xf32>
    %c46_105 = arith.constant 46 : index
    %463 = memref.load %arg3[%c46_105] : memref<48xf32, #tpu.memory_space<smem>>
    %464 = vector.broadcast %463 : f32 to vector<8x128xf32>
    %465 = arith.mulf %464, %263 : vector<8x128xf32>
    %466 = arith.addf %462, %465 : vector<8x128xf32>
    %c11_106 = arith.constant 11 : index
    %467 = memref.load %arg3[%c11_106] : memref<48xf32, #tpu.memory_space<smem>>
    %468 = vector.broadcast %467 : f32 to vector<8x128xf32>
    %469 = arith.mulf %468, %264 : vector<8x128xf32>
    %470 = arith.addf %466, %469 : vector<8x128xf32>
    %c23_107 = arith.constant 23 : index
    %471 = memref.load %arg3[%c23_107] : memref<48xf32, #tpu.memory_space<smem>>
    %472 = vector.broadcast %471 : f32 to vector<8x128xf32>
    %473 = arith.mulf %472, %265 : vector<8x128xf32>
    %474 = arith.addf %470, %473 : vector<8x128xf32>
    %c35_108 = arith.constant 35 : index
    %475 = memref.load %arg3[%c35_108] : memref<48xf32, #tpu.memory_space<smem>>
    %476 = vector.broadcast %475 : f32 to vector<8x128xf32>
    %477 = arith.mulf %476, %266 : vector<8x128xf32>
    %478 = arith.addf %474, %477 : vector<8x128xf32>
    %c47_109 = arith.constant 47 : index
    %479 = memref.load %arg3[%c47_109] : memref<48xf32, #tpu.memory_space<smem>>
    %480 = vector.broadcast %479 : f32 to vector<8x128xf32>
    %481 = arith.mulf %480, %267 : vector<8x128xf32>
    %482 = arith.addf %478, %481 : vector<8x128xf32>
    %cst_110 = arith.constant 0.000000e+00 : f32
    %483 = vector.broadcast %cst_110 : f32 to vector<8x128xf32>
    %484 = arith.maximumf %482, %483 : vector<8x128xf32>
    %c1_111 = arith.constant 1 : index
    %c3_112 = arith.constant 3 : index
    %c0_113 = arith.constant 0 : index
    %c0_114 = arith.constant 0 : index
    %485 = vector.load %arg5[%c1_111, %c3_112, %c0_113, %c0_114] : memref<2x4x8x128xf32, #tpu.memory_space<vmem>>, vector<1x1x8x128xf32>
    %486 = vector.shape_cast %485 : vector<1x1x8x128xf32> to vector<8x128xf32>
    %487 = vector.shape_cast %484 : vector<8x128xf32> to vector<1x1x8x128xf32>
    tpu.vector_store %arg5[%c1_111, %c3_112, %c0_113, %c0_114], %487 {strides = array<i32>} : memref<2x4x8x128xf32, #tpu.memory_space<vmem>>, vector<1x1x8x128xf32>,
    return
  }
  func.func @transform_0(%arg0: i32) -> (i32, i32, i32, i32) {
    %c0_i32 = arith.constant 0 : i32
    %c0_i32_0 = arith.constant 0 : i32
    %c0_i32_1 = arith.constant 0 : i32
    %c0_i32_2 = arith.constant 0 : i32
    return %arg0, %c0_i32, %c0_i32_0, %c0_i32_1 : i32, i32, i32, i32
  }
  func.func @transform_1(%arg0: i32) -> (i32, i32, i32) {
    %c0_i32 = arith.constant 0 : i32
    %c0_i32_0 = arith.constant 0 : i32
    %c0_i32_1 = arith.constant 0 : i32
    return %arg0, %c0_i32, %c0_i32_0 : i32, i32, i32
  }
  func.func @transform_2(%arg0: i32) -> i32 {
    %c0_i32 = arith.constant 0 : i32
    %c0_i32_0 = arith.constant 0 : i32
    return %c0_i32 : i32
  }
  func.func @transform_3(%arg0: i32) -> i32 {
    %c0_i32 = arith.constant 0 : i32
    %c0_i32_0 = arith.constant 0 : i32
    return %c0_i32 : i32
  }
  func.func @transform_4(%arg0: i32) -> (i32, i32, i32, i32) {
    %c0_i32 = arith.constant 0 : i32
    %c0_i32_0 = arith.constant 0 : i32
    %c0_i32_1 = arith.constant 0 : i32
    %c0_i32_2 = arith.constant 0 : i32
    return %arg0, %c0_i32, %c0_i32_0, %c0_i32_1 : i32, i32, i32, i32
  }
}

</mosaic_0001>

<bundles_post_ra>
// kernel: tpu_custom_call.1
= control target key start
LH: loop header
LB: loop body
LE: loop exit
PB: predicated region body
PF: predicated region fallthrough
CT: control target
= control target key end

     0   :  { %s2085_s0 = inlined_call_operand.hbm [shape: f32[4,4,8,128], index: 0, kind: input, shape index: {}]   ;;  %s2086_s1 = inlined_call_operand.hbm [shape: bf16[4,128,128], index: 1, kind: input, shape index: {}]   ;;  %s2087_s2 = inlined_call_operand.vmem [shape: f32[48], index: 2, kind: input, shape index: {}]   ;;  %s2088_s3 = inlined_call_operand.vmem [shape: f32[4], index: 3, kind: input, shape index: {}]   ;;  %s2089_s4 = inlined_call_operand.hbm [shape: f32[4,4,8,128], index: 4, kind: output, shape index: {}]  }
   0x1   :  { %2090 = sst [smem:[#allocation17_spill]] %s2085_s0 }
   0x2   :  { %2091 = sst [smem:[#allocation18_spill]] %s2087_s2 }
   0x3   :  { %2092 = sst [smem:[#allocation19_spill]] %s2088_s3 }
   0x4   :  { %9 = vsyncpa [#allocation3], 0 }
   0x5   :  { %11 = vsyncpa [#allocation3 + $0x1], 0 }
   0x6   :  { %12 = vsyncpa [#allocation7], 0 }
   0x7   :  { %14 = vsyncpa [#allocation7 + $0x1], 0 }
   0x8   :  { %15 = vsyncpa [#allocation5], 0 }
   0x9   :  { %16 = vsyncpa [#allocation10], 0 }
   0xa   :  { %17 = vsyncpa [#allocation4], 0 }
   0xb   :  { %19 = vsyncpa [#allocation4 + $0x1], 0  ;;  %s1607_s15 = smov 0   ;;  %s1609_s16 = smov 0  }
   0xc   :  { %s1611_s17 = smov 0   ;;  %s1613_s18 = smov 0  }
   0xd LB: > { %s1628_s19 = sadd.s32 4294967295, %s1572_s18   ;;  %s1088_s20 = sadd.s32 4294967294, %s1572_s18   ;;  %s1572_s18 = sphi %s1613_s18, %s2106_s18   ;;  %s1568_s17 = sphi %s1611_s17, %s2105_s17   ;;  %s1564_s16 = sphi %s1609_s16, %s2104_s16   ;;  %s1560_s15 = sphi %s1607_s15, %s2103_s15  }
   0xe   : > { %s1632_s21 = sadd.s32 1, %s1572_s18   ;;  %s32_s22 = sadd.s32 1, %s1568_s17 }
   0xf   : > { %s29_s23 = ssub.s32 %s1572_s18, %s1632_s21  ;;  %p39_p0 = scmp.ne.s32.totalorder %s1568_s17, %s1564_s16 }
  0x10   : > { %p30_p1 = scmp.eq.s32.totalorder %s29_s23, 0  ;;  %p40_p2 = scmp.eq.s32.totalorder %s1572_s18, 0 }
  0x11   : > { %p45_p3 = scmp.ne.s32.totalorder %s1564_s16, %s1560_s15  ;;  %p46_p4 = scmp.eq.s32.totalorder %s1628_s19, 0 }
  0x12   : > { %s1644_s24 = scalar_select %p30_p1, %s1568_s17, %s32_s22  }
  0x13   : > { %p1646_p5 = por %p40_p2, %p39_p0  ;;  %p1652_p6 = por %p46_p4, %p45_p3 }
  0x14   : > { %p137_p7 = scmp.eq.s32.totalorder %s1628_s19, 1  ;;  %p143_p8 = scmp.eq.s32.totalorder %s1088_s20, 1 }
  0x15   : > { %p1089_p9 = scmp.ge.s32.totalorder %s1572_s18, 1  ;;  %p150_p10 = scmp.lt.s32.totalorder %s1572_s18, 3 }
  0x16   : > { %p1659_p11 = por %p137_p7, %p39_p0  ;;  %p1663_p12 = por %p143_p8, %p45_p3 }
  0x17   : > { %p1667_p13 = pnand %p1089_p9, %p150_p10  ;;  %s2098_s2 = sld [smem:[#allocation18_spill]] }
  0x18   : > { %p1360_p2 = scmp.lt.s32.totalorder %s1572_s18, 2  ;;  %s2099_s3 = sld [smem:[#allocation19_spill]] }
  0x19   : > { %p1340_p1 = pneg %p1667_p13  ;;  %s1574_s11 = smov [#allocation8]  }
  0x1a   : > { %p1685_p7 = pnand %p1360_p2, %p1646_p5  ;;  %s1690_s12 = sand.u32 1, %s1568_s17  }
  0x1b   : > { %p1341_p3 = pnand %p1340_p1, %p46_p4  ;;  %s1575_s13 = smov [#allocation9]  }
  0x1c   : > { %s1093_s14 = sshll.u32 %s1690_s12, 6  ;;  %s1305_s20 = sshll.u32 %s1572_s18, 6 }
  0x1d   : > { %s162_s6 = sshll.u32 %s2098_s2, 4  ;;  %s2101_s0 = sld [smem:[#allocation17_spill]]  ;;  %s163_s6 = int_to_ptr.vmem [resolvable:$true] %s162_s6 }
  0x1e   : > { %s172_s9 = sshll.u32 %s2099_s3, 4  ;;  %s187_s30 = scalar_lea.vmem [#allocation2], %s1093_s14  ;;  %s173_s9 = int_to_ptr.vmem [resolvable:$true] %s172_s9 }
  0x1f   : > { %1343 = dma.vmem_to_smem (!%p1341_p3), %s163_s6, 16, %s1574_s11, [#allocation5]  }
  0x20   : > { %1346 = dma.vmem_to_smem (!%p1341_p3), %s173_s9, 16, %s1575_s13, [#allocation10]  }
  0x21   : > { %s196_s5 = sshll.u32 %s187_s30, 4  ;;  %s184_s6 = scalar_lea.sflag [#allocation3], %s1690_s12  ;;  %s197_s5 = int_to_ptr.vmem [resolvable:$true] %s196_s5 }
  0x22   : > { %p1438_p8 = pneg %p1685_p7 }
  0x23   : > { %s193_s25 = scalar_lea.hbm %s2101_s0, %s1305_s20  ;;  %s1441_s20 = scalar_lea.hbm %s2101_s0, 128 }
  0x24   : > { %s194_s7 = sshll.u32 %s193_s25, 4  ;;  %s195_s7 = int_to_ptr.hbm [resolvable:$true] %s194_s7 }
  0x25   : > { %s1434_s8 = sshra.s32 %s195_s7, 4  ;;  %s1435_s8 = int_to_ptr.hbm [resolvable:$true] %s1434_s8 }
  0x26   : > { %s1436_s11 = scalar_lea.hbm %s1435_s8, 64  ;;  %p1442_p1 = scmp.lt.s32.totalorder %s1435_s8, %s2101_s0 }
  0x27   : > { %p1437_p5 = scmp.ne.s32.totalorder %s1435_s8, %s1436_s11  ;;  %p1443_p2 = scmp.lt.s32.totalorder %s1441_s20, %s1436_s11 }
  0x29   : > { %p1439_p9 = pnand %p1438_p8, %p1437_p5  ;;  %p1444_p3 = por %p1443_p2, %p1442_p1 }
  0x2b   : > { %p1440_p10 = pneg %p1439_p9 }
  0x2d   : > { %p1445_p0 = pnand %p1444_p3, %p1440_p10 }
  0x2f   : > { %1448 = shalt.err (!%p1445_p0)
}
  0x30   : > { %s1576_s23 = smov 128   ;;  %s1577_s25 = smov 8  }
  0x31   : > { %1350 = dma.hbm_to_vmem [thread:$0]  (!%p1685_p7), %s195_s7, 1024, %s197_s5, %s184_s6, %s1576_s23, %s1576_s23, %s1577_s25  }
  0x32   : > { %s1097_s30 = sshll.u32 %s1690_s12, 7  ;;  %s1307_s9 = sshll.u32 %s1572_s18, 7 }
  0x33   : > { %s216_s14 = scalar_lea.hbm %s2086_s1, %s1307_s9  ;;  %s210_s11 = scalar_lea.vmem [#allocation6], %s1097_s30 }
  0x34   : > { %s217_s8 = sshll.u32 %s216_s14, 4  ;;  %s219_s20 = sshll.u32 %s210_s11, 4  ;;  %s218_s8 = int_to_ptr.hbm [resolvable:$true] %s217_s8  ;;  %s220_s20 = int_to_ptr.vmem [resolvable:$true] %s219_s20 }
  0x35   : > { %s207_s22 = scalar_lea.sflag [#allocation7], %s1690_s12  ;;  %s1464_s0 = sshra.s32 %s218_s8, 4  ;;  %s1465_s0 = int_to_ptr.hbm [resolvable:$true] %s1464_s0 }
  0x36   : > { %s1466_s3 = scalar_lea.hbm %s1465_s0, 128  ;;  %s1471_s6 = scalar_lea.hbm %s2086_s1, 256 }
  0x37   : > { %p1467_p0 = scmp.ne.s32.totalorder %s1465_s0, %s1466_s3  ;;  %p1472_p10 = scmp.lt.s32.totalorder %s1465_s0, %s2086_s1 }
  0x38   : > { %p1473_p1 = scmp.lt.s32.totalorder %s1471_s6, %s1466_s3 }
  0x39   : > { %p1469_p5 = pnand %p1467_p0, %p1438_p8 }
  0x3a   : > { %p1474_p2 = por %p1473_p1, %p1472_p10 }
  0x3b   : > { %p1470_p9 = pneg %p1469_p5 }
  0x3d   : > { %p1475_p3 = pnand %p1474_p2, %p1470_p9 }
  0x3f   : > { %1478 = shalt.err (!%p1475_p3)
}
  0x40   : > { %s1578_s12 = smov 64   ;;  %s1579_s25 = smov 4  }
  0x41   : > { %1353 = dma.hbm_to_vmem [thread:$0]  (!%p1685_p7), %s218_s8, 2048, %s220_s20, %s207_s22, %s1578_s12, %s1578_s12, %s1579_s25  }
  0x42   : > { %231 = sbr.rel (%p1667_p13) target bundleno = 430 (0x1ae), region = 36  ;;  %s1731_s30 = sand.u32 (!%p1667_p13), 1, %s1564_s16  }
  0x43   : > { %s1102_s0 = sshll.u32 (!%p1667_p13), %s1731_s30, 6  ;;  %s234_s3 = scalar_lea.sflag (!%p1667_p13), [#allocation3], %s1731_s30 }
  0x44   : > { %s1737_s9 = scalar_lea.vmem (!%p1667_p13), [#allocation2], %s1102_s0 }
  0x47   : > { %1539 = dma.done.wait (%p1652_p6), %s234_s3, 1024  }
  0x48   : > { %1541 = vsyncadd (%p1652_p6), %s234_s3, 4294966272  ;;  %s1103_s29 = sshll.u32 %s1731_s30, 7  ;;  %s244_s10 = scalar_lea.sflag [#allocation7], %s1731_s30 }
  0x49   : > { %s1745_s13 = scalar_lea.vmem [#allocation6], %s1103_s29 }
  0x4a   : > { %1543 = dma.done.wait (%p1652_p6), %s244_s10, 2048  }
  0x4b   : > { %1545 = vsyncadd (%p1652_p6), %s244_s10, 4294965248 }
  0x4c   : > { %1547 = dma.done.wait (%p46_p4), [#allocation5], 16  }
  0x4d   : > { %1549 = vsyncadd (%p46_p4), [#allocation5], 4294967280 }
  0x4e   : > { %1551 = dma.done.wait (%p46_p4), [#allocation10], 16  }
  0x4f   : > { %1553 = vsyncadd (%p46_p4), [#allocation10], 4294967280 }
  0x50   : > { %263 = sfence }
  0x51   : > { %v1315_v0 = vld [vmem:[%s1745_s13 + $0x38] sm:$0xff]  ;;  %v1314_v2 = vld [vmem:[%s1745_s13 + $0x30] sm:$0xff]  ;;  %v1313_v4 = vld [vmem:[%s1745_s13 + $0x28] sm:$0xff]  ;;  %s1807_s26 = sld [smem:[#allocation8]] }
  0x52   : > { %v1323_v1 = vld [vmem:[%s1745_s13 + $0x78] sm:$0xff]  ;;  %384 = vmatpush.bf16.msra.mxu0 %v1315_v0  ;;  %v1322_v3 = vld [vmem:[%s1745_s13 + $0x70] sm:$0xff]  ;;  %474 = vmatpush.bf16.msra.mxu2 %v1315_v0  ;;  %v1321_v5 = vld [vmem:[%s1745_s13 + $0x68] sm:$0xff]  ;;  %s1809_s14 = sld [smem:[#allocation8 + $0x3]] }
  0x53   : > { %453 = vmatpush.bf16.msra.mxu1 %v1323_v1  ;;  %503 = vmatpush.bf16.msra.mxu3 %v1323_v1  ;;  %v1312_v6 = vld [vmem:[%s1745_s13 + $0x20] sm:$0xff]  ;;  %v1311_v8 = vld [vmem:[%s1745_s13 + $0x18] sm:$0xff]  ;;  %v1310_v10 = vld [vmem:[%s1745_s13 + $0x10] sm:$0xff]  ;;  %s1811_s8 = sld [smem:[#allocation8 + $0x6]] }
  0x54   : > { %v1320_v7 = vld [vmem:[%s1745_s13 + $0x60] sm:$0xff]  ;;  %v1319_v9 = vld [vmem:[%s1745_s13 + $0x58] sm:$0xff]  ;;  %v1318_v11 = vld [vmem:[%s1745_s13 + $0x50] sm:$0xff]  ;;  %s1813_s11 = sld [smem:[#allocation8 + $0x9]] }
  0x55   : > { %v1309_v12 = vld [vmem:[%s1745_s13 + $0x8] sm:$0xff]  ;;  %v1308_v14 = vld [vmem:[%s1745_s13] sm:$0xff]  ;;  %v1792_v22 = vld [vmem:[%s1737_s9 + $0x10] sm:$0xff]  ;;  %s1815_s20 = sld [smem:[#allocation9]] }
  0x56   : > { %385 = vmatpush.bf16.msra.mxu0 %v1314_v2  ;;  %475 = vmatpush.bf16.msra.mxu2 %v1314_v2  ;;  %v1317_v13 = vld [vmem:[%s1745_s13 + $0x48] sm:$0xff]  ;;  %v1316_v15 = vld [vmem:[%s1745_s13 + $0x40] sm:$0xff]  ;;  %v1795_v23 = vld [vmem:[%s1737_s9 + $0x18] sm:$0xff]  ;;  %s1817_s22 = sld [smem:[#allocation8 + $0xc]] }
  0x57   : > { %454 = vmatpush.bf16.msra.mxu1 %v1322_v3  ;;  %504 = vmatpush.bf16.msra.mxu3 %v1322_v3  ;;  %v1776_v16 = vld [vmem:[%s1737_s9] sm:$0xff]  ;;  %v1779_v17 = vld [vmem:[%s1737_s9 + $0x8] sm:$0xff]  ;;  %v1798_v24 = vld [vmem:[%s1737_s9 + $0x30] sm:$0xff]  ;;  %v335_v26 = vpack.c.bf16 %v1795_v23, %v1792_v22  ;;  %s1819_s5 = sld [smem:[#allocation8 + $0x18]]  ;;  %v533_v28 = vstv %s1807_s26 }
  0x58   : > { %v1782_v18 = vld [vmem:[%s1737_s9 + $0x20] sm:$0xff]  ;;  %v1785_v19 = vld [vmem:[%s1737_s9 + $0x28] sm:$0xff]  ;;  %v334_v20 = vpack.c.bf16 %v1779_v17, %v1776_v16  ;;  %v1801_v25 = vld [vmem:[%s1737_s9 + $0x38] sm:$0xff]  ;;  %s1821_s7 = sld [smem:[#allocation9 + $0x1]]  ;;  %v585_v29 = vstv %s1809_s14  ;;  %v534_v30 = vmul.f32 %v533_v28, %v1776_v16 }
  0x59   : > { %v403_v21 = vpack.c.bf16 %v1785_v19, %v1782_v18  ;;  %v404_v27 = vpack.c.bf16 %v1801_v25, %v1798_v24  ;;  %s1823_s6 = sld [smem:[#allocation8 + $0xf]]  ;;  %v586_v31 = vmul.f32 %v585_v29, %v1776_v16  ;;  %v638_v34 = vstv %s1811_s8 }
  0x5a   : > { %386 = vmatpush.bf16.msra.mxu0 %v1313_v4  ;;  %476 = vmatpush.bf16.msra.mxu2 %v1313_v4  ;;  %s1825_s2 = sld [smem:[#allocation8 + $0x1b]]  ;;  %v691_v37 = vstv %s1813_s11  ;;  %v639_v40 = vmul.f32 %v638_v34, %v1776_v16  ;;  %v745_v48 = vmul.f32 %v1782_v18, %v533_v28  ;;  %v798_v49 = vmul.f32 %v1782_v18, %v585_v29 }
  0x5b   : > { %455 = vmatpush.bf16.msra.mxu1 %v1321_v5  ;;  %505 = vmatpush.bf16.msra.mxu3 %v1321_v5  ;;  %s1827_s23 = sld [smem:[#allocation9 + $0x2]]  ;;  %v531_v32 = vstv %s1815_s20  ;;  %v692_v44 = vmul.f32 %v691_v37, %v1776_v16  ;;  %v851_v52 = vmul.f32 %v1782_v18, %v638_v34  ;;  %v904_v53 = vmul.f32 %v1782_v18, %v691_v37 }
  0x5c   : > { %s1830_s12 = sld [smem:[#allocation8 + $0x12]]  ;;  %v537_v33 = vstv %s1817_s22  ;;  %v535_v38 = vadd.f32 %v534_v30, %v531_v32  ;;  %v746_v0 = vadd.f32 %v745_v48, %v531_v32 }
  0x5d   : > { %s1833_s25 = sld [smem:[#allocation9 + $0x3]]  ;;  %v538_v39 = vmul.f32 %v537_v33, %v1779_v17  ;;  %v541_v41 = vstv %s1819_s5  ;;  %v749_v1 = vmul.f32 %v1785_v19, %v537_v33 }
  0x5e   : > { %387 = vmatpush.bf16.msra.mxu0 %v1312_v6  ;;  %477 = vmatpush.bf16.msra.mxu2 %v1312_v6  ;;  %s1835_s3 = sld [smem:[#allocation8 + $0x15]]  ;;  %v583_v35 = vstv %s1821_s7  ;;  %v542_v55 = vmul.f32 %v541_v41, %v1792_v22 }
  0x5f   : > { %456 = vmatpush.bf16.msra.mxu1 %v1320_v7  ;;  %506 = vmatpush.bf16.msra.mxu3 %v1320_v7  ;;  %s1841_s9 = sld [smem:[#allocation8 + $0x1e]]  ;;  %v589_v36 = vstv %s1823_s6  ;;  %v587_v42 = vadd.f32 %v586_v31, %v583_v35  ;;  %v539_v54 = vadd.f32 %v538_v39, %v535_v38  ;;  %v799_v2 = vadd.f32 %v798_v49, %v583_v35 }
  0x60   : > { %s1846_s29 = sld [smem:[#allocation8 + $0x21]]  ;;  %v590_v43 = vmul.f32 %v589_v36, %v1779_v17  ;;  %v593_v45 = vstv %s1825_s2  ;;  %v802_v3 = vmul.f32 %v1785_v19, %v589_v36 }
  0x61   : > { %s1849_s10 = sld [smem:[#allocation8 + $0x24]]  ;;  %v636_v46 = vstv %s1827_s23  ;;  %v594_v57 = vmul.f32 %v593_v45, %v1792_v22  ;;  %v543_v32 = vadd.f32 %v542_v55, %v539_v54 }
  0x62   : > { %388 = vmatpush.bf16.msra.mxu0 %v1311_v8  ;;  %478 = vmatpush.bf16.msra.mxu2 %v1311_v8  ;;  %s1852_s13 = sld [smem:[#allocation8 + $0x27]]  ;;  %v642_v47 = vstv %s1830_s12  ;;  %v591_v56 = vadd.f32 %v590_v43, %v587_v42  ;;  %v640_v58 = vadd.f32 %v639_v40, %v636_v46  ;;  %v852_v4 = vadd.f32 %v851_v52, %v636_v46 }
  0x63   : > { %457 = vmatpush.bf16.msra.mxu1 %v1319_v9  ;;  %507 = vmatpush.bf16.msra.mxu3 %v1319_v9  ;;  %s1857_s26 = sld [smem:[#allocation8 + $0x2a]]  ;;  %v689_v50 = vstv %s1833_s25  ;;  %v643_v59 = vmul.f32 %v642_v47, %v1779_v17  ;;  %v855_v5 = vmul.f32 %v1785_v19, %v642_v47 }
  0x64   : > { %s1863_s14 = sld [smem:[#allocation8 + $0x2d]]  ;;  %v695_v51 = vstv %s1835_s3  ;;  %v693_v61 = vadd.f32 %v692_v44, %v689_v50  ;;  %v905_v6 = vadd.f32 %v904_v53, %v689_v50  ;;  %v595_v34 = vadd.f32 %v594_v57, %v591_v56 }
  0x65   : > { %v646_v60 = vstv %s1841_s9  ;;  %v696_v62 = vmul.f32 %v695_v51, %v1779_v17  ;;  %s1877_s8 = sld [smem:[#allocation8 + $0x1]]  ;;  %v908_v7 = vmul.f32 %v1785_v19, %v695_v51  ;;  %v856_v28 = vadd.f32 %v855_v5, %v852_v4 }
  0x66   : > { %389 = vmatpush.bf16.msra.mxu0 %v1310_v10  ;;  %479 = vmatpush.bf16.msra.mxu2 %v1310_v10  ;;  %v699_v63 = vstv %s1846_s29  ;;  %s1881_s11 = sld [smem:[#allocation8 + $0x4]]  ;;  %v644_v10 = vadd.f32 %v643_v59, %v640_v58  ;;  %v859_v29 = vmul.f32 %v1798_v24, %v646_v60 }
  0x67   : > { %458 = vmatpush.bf16.msra.mxu1 %v1318_v11  ;;  %508 = vmatpush.bf16.msra.mxu3 %v1318_v11  ;;  %v545_v8 = vstv %s1849_s10  ;;  %v647_v11 = vmul.f32 %v646_v60, %v1792_v22  ;;  %s1888_s20 = sld [smem:[#allocation8 + $0x7]]  ;;  %v909_v30 = vadd.f32 %v908_v7, %v905_v6  ;;  %v912_v31 = vmul.f32 %v1798_v24, %v699_v63 }
  0x68   : > { %v597_v9 = vstv %s1852_s13  ;;  %s1893_s22 = sld [smem:[#allocation8 + $0xa]]  ;;  %v546_v33 = vmul.f32 %v545_v8, %v1795_v23  ;;  %v757_v39 = vmul.f32 %v1801_v25, %v545_v8 }
  0x69   : > { %v598_v35 = vmul.f32 %v597_v9, %v1795_v23  ;;  %s1901_s5 = sld [smem:[#allocation8 + $0xd]]  ;;  %v648_v36 = vadd.f32 %v647_v11, %v644_v10  ;;  %v810_v42 = vmul.f32 %v1801_v25, %v597_v9  ;;  %v913_v46 = vadd.f32 %v912_v31, %v909_v30 }
  0x6a   : > { %390 = vmatpush.bf16.msra.mxu0 %v1309_v12  ;;  %480 = vmatpush.bf16.msra.mxu2 %v1309_v12  ;;  %v650_v12 = vstv %s1857_s26  ;;  %s1906_s7 = sld [smem:[#allocation8 + $0x10]]  ;;  %v547_v54 = vadd.f32 %v546_v33, %v543_v32 }
  0x6b   : > { %459 = vmatpush.bf16.msra.mxu1 %v1317_v13  ;;  %509 = vmatpush.bf16.msra.mxu3 %v1317_v13  ;;  %v697_v13 = vadd.f32 %v696_v62, %v693_v61  ;;  %v651_v37 = vmul.f32 %v650_v12, %v1795_v23  ;;  %v863_v43 = vmul.f32 %v1801_v25, %v650_v12  ;;  %s1910_s6 = sld [smem:[#allocation8 + $0x13]]  ;;  %v549_v49 = vstv %s1877_s8 }
  0x6c   : > { %s1913_s2 = sld [smem:[#allocation8 + $0x16]]  ;;  %v601_v50 = vstv %s1881_s11  ;;  %v599_v55 = vadd.f32 %v598_v35, %v595_v34 }
  0x6d   : > { %v654_v51 = vstv %s1888_s20  ;;  %v652_v56 = vadd.f32 %v651_v37, %v648_v36  ;;  %s1925_s23 = sld [smem:[#allocation8 + $0x19]] }
  0x6e   : > { %391 = vmatpush.bf16.msra.mxu0 %v1308_v14  ;;  %481 = vmatpush.bf16.msra.mxu2 %v1308_v14  ;;  %v700_v14 = vmul.f32 %v699_v63, %v1792_v22  ;;  %v707_v52 = vstv %s1893_s22  ;;  %s1927_s12 = sld [smem:[#allocation8 + $0x1c]] }
  0x6f   : > { %460 = vmatpush.bf16.msra.mxu1 %v1316_v15  ;;  %510 = vmatpush.bf16.msra.mxu3 %v1316_v15  ;;  %v703_v15 = vstv %s1863_s14  ;;  %s1929_s25 = sld [smem:[#allocation8 + $0x1f]]  ;;  %v553_v6 = vstv %s1901_s5 }
  0x70   : > { %v704_v38 = vmul.f32 %v703_v15, %v1795_v23  ;;  %v701_v40 = vadd.f32 %v700_v14, %v697_v13  ;;  %v916_v47 = vmul.f32 %v1801_v25, %v703_v15  ;;  %v605_v7 = vstv %s1906_s7  ;;  %s1935_s3 = sld [smem:[#allocation8 + $0x22]] }
  0x71   : > { %392 = vmatmul.bf16.vlgmr.msra.gmra.mxu0 %v334_v20  ;;  %v750_v20 = vadd.f32 %v749_v1, %v746_v0  ;;  %v658_v8 = vstv %s1910_s6  ;;  %s1937_s9 = sld [smem:[#allocation8 + $0x25]] }
  0x72   : > { %461 = vmatmul.bf16.vlgmr.msra.gmra.mxu1 %v403_v21  ;;  %v753_v21 = vmul.f32 %v1798_v24, %v541_v41  ;;  %v705_v57 = vadd.f32 %v704_v38, %v701_v40  ;;  %v917_v61 = vadd.f32 %v916_v47, %v913_v46  ;;  %v711_v9 = vstv %s1913_s2  ;;  %s1939_s29 = sld [smem:[#allocation8 + $0x28]] }
  0x73   : > { %s1942_s10 = sld [smem:[#allocation8 + $0x2b]]  ;;  %v557_v46 = vstv %s1925_s23 }
  0x74   : > { %v754_v41 = vadd.f32 %v753_v21, %v750_v20  ;;  %v609_v47 = vstv %s1927_s12  ;;  %s1948_s13 = sld [smem:[#allocation8 + $0x2e]] }
  0x75   : > { %s1970_s26 = sld [smem:[#allocation8 + $0x2]] }
  0x76   : > { %v758_v58 = vadd.f32 %v757_v39, %v754_v41  ;;  %s1972_s14 = sld [smem:[#allocation8 + $0x5]] }
  0x77   : > { %s1974_s8 = sld [smem:[#allocation8 + $0x8]] }
  0x78   : > { %s1976_s11 = sld [smem:[#allocation8 + $0xb]] }
  0x79   : > { %s1978_s20 = sld [smem:[#allocation8 + $0xe]] }
  0x7a   : > { %s1980_s22 = sld [smem:[#allocation8 + $0x11]] }
  0x7b   : > { %s1982_s5 = sld [smem:[#allocation8 + $0x14]] }
  0x7c   : > { %s1984_s7 = sld [smem:[#allocation8 + $0x17]] }
  0x7d   : > { %s1986_s6 = sld [smem:[#allocation8 + $0x1a]] }
  0x7e   : > { %s1988_s2 = sld [smem:[#allocation8 + $0x1d]] }
  0x7f   : > { %s1990_s23 = sld [smem:[#allocation8 + $0x20]] }
  0x80   : > { %s1992_s12 = sld [smem:[#allocation8 + $0x23]] }
  0x81   : > { %397 = vmatmul.bf16.gmra.mxu0 %v335_v26  ;;  %v803_v26 = vadd.f32 %v802_v3, %v799_v2 }
  0x82   : > { %466 = vmatmul.bf16.gmra.mxu1 %v404_v27  ;;  %v806_v27 = vmul.f32 %v1798_v24, %v593_v45  ;;  %v860_v45 = vadd.f32 %v859_v29, %v856_v28 }
  0x84   : > { %v807_v44 = vadd.f32 %v806_v27, %v803_v26  ;;  %v864_v60 = vadd.f32 %v863_v43, %v860_v45 }
  0x86   : > { %v811_v59 = vadd.f32 %v810_v42, %v807_v44 }
  0xee   : > { %v1915_v48 = vpop.f32.mrf.mxu0 }
  0xef   : > { %v462_v53 = vpop.f32.mrf.mxu1  ;;  %v550_v62 = vmul.f32 %v549_v49, %v1915_v48  ;;  %v602_v63 = vmul.f32 %v601_v50, %v1915_v48  ;;  %v655_v0 = vmul.f32 %v654_v51, %v1915_v48  ;;  %v708_v1 = vmul.f32 %v707_v52, %v1915_v48 }
  0xf0   : > { %v761_v2 = vmul.f32 %v549_v49, %v462_v53  ;;  %v814_v3 = vmul.f32 %v601_v50, %v462_v53  ;;  %v867_v4 = vmul.f32 %v654_v51, %v462_v53  ;;  %v920_v5 = vmul.f32 %v707_v52, %v462_v53 }
  0xf1   : > { %v551_v10 = vadd.f32 %v550_v62, %v547_v54  ;;  %v603_v11 = vadd.f32 %v602_v63, %v599_v55  ;;  %v656_v12 = vadd.f32 %v655_v0, %v652_v56  ;;  %v709_v13 = vadd.f32 %v708_v1, %v705_v57 }
  0xf2   : > { %v762_v14 = vadd.f32 %v761_v2, %v758_v58  ;;  %v815_v15 = vadd.f32 %v814_v3, %v811_v59  ;;  %v868_v20 = vadd.f32 %v867_v4, %v864_v60  ;;  %v921_v21 = vadd.f32 %v920_v5, %v917_v61 }
  0xf3   : > { %v662_v49 = vstv %s1929_s25  ;;  %v715_v50 = vstv %s1935_s3  ;;  %v561_v4 = vstv %s1937_s9  ;;  %v613_v5 = vstv %s1939_s29  ;;  %s1994_s25 = sld [smem:[#allocation8 + $0x26]] }
  0xf4   : > { %s1996_s3 = sld [smem:[#allocation8 + $0x29]] }
  0xf5   : > { %s1998_s9 = sld [smem:[#allocation8 + $0x2c]] }
  0xf6   : > { %v395_v26 = vpop.f32.mrf.mxu0  ;;  %s2000_s29 = sld [smem:[#allocation8 + $0x2f]] }
  0xf7   : > { %v464_v27 = vpop.f32.mrf.mxu1  ;;  %v554_v28 = vmul.f32 %v553_v6, %v395_v26  ;;  %v606_v29 = vmul.f32 %v605_v7, %v395_v26  ;;  %v659_v30 = vmul.f32 %v658_v8, %v395_v26  ;;  %v712_v31 = vmul.f32 %v711_v9, %v395_v26 }
  0xf8   : > { %v765_v32 = vmul.f32 %v553_v6, %v464_v27  ;;  %v818_v33 = vmul.f32 %v605_v7, %v464_v27  ;;  %v871_v34 = vmul.f32 %v658_v8, %v464_v27  ;;  %v924_v35 = vmul.f32 %v711_v9, %v464_v27 }
  0xf9   : > { %v555_v36 = vadd.f32 %v554_v28, %v551_v10  ;;  %v607_v37 = vadd.f32 %v606_v29, %v603_v11  ;;  %v660_v38 = vadd.f32 %v659_v30, %v656_v12  ;;  %v713_v39 = vadd.f32 %v712_v31, %v709_v13 }
  0xfa   : > { %v766_v40 = vadd.f32 %v765_v32, %v762_v14  ;;  %v819_v41 = vadd.f32 %v818_v33, %v815_v15  ;;  %v872_v42 = vadd.f32 %v871_v34, %v868_v20  ;;  %v925_v43 = vadd.f32 %v924_v35, %v921_v21 }
  0xfb   : > { %v472_v44 = vpack.c.bf16 %v395_v26, %v1915_v48  ;;  %v501_v45 = vpack.c.bf16 %v464_v27, %v462_v53  ;;  %v666_v6 = vstv %s1942_s10  ;;  %v719_v7 = vstv %s1948_s13  ;;  %s1325_s10 = sshll.u32 %s1628_s19, 6 }
  0xfd   : > { %482 = vmatmul.bf16.vlgmr.msra.gmra.mxu2 %v472_v44  ;;  %511 = vmatmul.bf16.vlgmr.msra.gmra.mxu3 %v501_v45  ;;  %v617_v44 = vstv %s1972_s14  ;;  %v670_v45 = vstv %s1974_s8  ;;  %s966_s14 = scalar_lea.hbm %s2089_s4, %s1325_s10  ;;  %s288_s8 = scalar_lea.vmem [#allocation11], %s1102_s0 }
  0xfe   : > { %v398_v51 = vpop.f32.mrf.mxu0  ;;  %s967_s19 = sshll.u32 %s288_s8, 4  ;;  %s968_s19 = int_to_ptr.vmem [resolvable:$true] %s967_s19 }
  0xff   : > { %v467_v52 = vpop.f32.mrf.mxu1  ;;  %v558_v54 = vmul.f32 %v557_v46, %v398_v51  ;;  %v610_v55 = vmul.f32 %v609_v47, %v398_v51  ;;  %v663_v56 = vmul.f32 %v662_v49, %v398_v51  ;;  %v716_v48 = vmul.f32 %v715_v50, %v398_v51 }
 0x100   : > { %v769_v53 = vmul.f32 %v557_v46, %v467_v52  ;;  %v822_v57 = vmul.f32 %v609_v47, %v467_v52  ;;  %v875_v58 = vmul.f32 %v662_v49, %v467_v52  ;;  %v928_v59 = vmul.f32 %v715_v50, %v467_v52 }
 0x101   : > { %v559_v60 = vadd.f32 %v558_v54, %v555_v36  ;;  %v611_v61 = vadd.f32 %v610_v55, %v607_v37  ;;  %v664_v62 = vadd.f32 %v663_v56, %v660_v38  ;;  %v717_v63 = vadd.f32 %v716_v48, %v713_v39 }
 0x102   : > { %v770_v0 = vadd.f32 %v769_v53, %v766_v40  ;;  %v823_v1 = vadd.f32 %v822_v57, %v819_v41  ;;  %v876_v2 = vadd.f32 %v875_v58, %v872_v42  ;;  %v929_v3 = vadd.f32 %v928_v59, %v925_v43 }
 0x103   : > { %v565_v43 = vstv %s1970_s26  ;;  %v723_v47 = vstv %s1976_s11  ;;  %v569_v49 = vstv %s1978_s20  ;;  %v621_v50 = vstv %s1980_s22  ;;  %s969_s11 = sshll.u32 %s966_s14, 4  ;;  %s954_s20 = scalar_lea.sflag [#allocation4], %s1731_s30  ;;  %s970_s11 = int_to_ptr.hbm [resolvable:$true] %s969_s11 }
 0x104   : > { %v727_v54 = vstv %s1984_s7  ;;  %v573_v55 = vstv %s1986_s6  ;;  %v625_v56 = vstv %s1988_s2  ;;  %v678_v53 = vstv %s1990_s23  ;;  %s1508_s0 = sshra.s32 %s970_s11, 4  ;;  %s1514_s6 = scalar_lea.hbm %s2089_s4, 128  ;;  %s1509_s0 = int_to_ptr.hbm [resolvable:$true] %s1508_s0 }
 0x105   : > { %v731_v57 = vstv %s1992_s12  ;;  %s1510_s22 = scalar_lea.hbm %s1509_s0, 64  ;;  %p1515_p7 = scmp.lt.s32.totalorder %s1509_s0, %s2089_s4 }
 0x106   : > { %v400_v8 = vpop.f32.mrf.mxu0  ;;  %p1511_p4 = scmp.ne.s32.totalorder %s1509_s0, %s1510_s22  ;;  %p1516_p8 = scmp.lt.s32.totalorder %s1514_s6, %s1510_s22 }
 0x107   : > { %v469_v9 = vpop.f32.mrf.mxu1  ;;  %v562_v10 = vmul.f32 %v561_v4, %v400_v8  ;;  %v614_v11 = vmul.f32 %v613_v5, %v400_v8  ;;  %v667_v12 = vmul.f32 %v666_v6, %v400_v8  ;;  %v720_v13 = vmul.f32 %v719_v7, %v400_v8 }
 0x108   : > { %v773_v14 = vmul.f32 %v561_v4, %v469_v9  ;;  %v826_v15 = vmul.f32 %v613_v5, %v469_v9  ;;  %v879_v20 = vmul.f32 %v666_v6, %v469_v9  ;;  %v932_v21 = vmul.f32 %v719_v7, %v469_v9  ;;  %p1512_p6 = pnand %p1511_p4, %p1659_p11  ;;  %p1517_p0 = por %p1516_p8, %p1515_p7 }
 0x109   : > { %v1954_v26 = vadd.f32 %v562_v10, %v559_v60  ;;  %v1956_v27 = vadd.f32 %v614_v11, %v611_v61  ;;  %v1958_v28 = vadd.f32 %v667_v12, %v664_v62  ;;  %v1960_v29 = vadd.f32 %v720_v13, %v717_v63 }
 0x10a   : > { %v1962_v30 = vadd.f32 %v773_v14, %v770_v0  ;;  %v1964_v31 = vadd.f32 %v826_v15, %v823_v1  ;;  %v1966_v32 = vadd.f32 %v879_v20, %v876_v2  ;;  %v1968_v33 = vadd.f32 %v932_v21, %v929_v3  ;;  %p1513_p13 = pneg %p1512_p6 }
 0x10b   : > { %v473_v34 = vpack.c.bf16 %v400_v8, %v398_v51  ;;  %v502_v35 = vpack.c.bf16 %v469_v9, %v467_v52  ;;  %v674_v51 = vstv %s1982_s5  ;;  %v577_v61 = vstv %s1994_s25 }
 0x10c   : > { %v629_v63 = vstv %s1996_s3  ;;  %v682_v0 = vstv %s1998_s9  ;;  %v735_v1 = vstv %s2000_s29  ;;  %p1518_p5 = pnand %p1517_p0, %p1513_p13 }
 0x10d   : > { %487 = vmatmul.bf16.gmra.mxu2 %v473_v34  ;;  %516 = vmatmul.bf16.gmra.mxu3 %v502_v35 }
 0x180   : > { %v483_v36 = vpop.f32.mrf.mxu2  ;;  %v512_v37 = vpop.f32.mrf.mxu3 }
 0x181   : > { %v493_v38 = vmul.f32 2.0, %v483_v36  ;;  %v522_v39 = vmul.f32 2.0, %v512_v37 }
 0x183   : > { %v497_v42 = vsub.f32 %v493_v38, %v1776_v16  ;;  %v526_v52 = vsub.f32 %v522_v39, %v1782_v18 }
 0x185   : > { %v566_v48 = vmul.f32 %v565_v43, %v497_v42  ;;  %v618_v58 = vmul.f32 %v617_v44, %v497_v42  ;;  %v671_v59 = vmul.f32 %v670_v45, %v497_v42  ;;  %v724_v62 = vmul.f32 %v723_v47, %v497_v42 }
 0x186   : > { %v777_v2 = vmul.f32 %v565_v43, %v526_v52  ;;  %v830_v3 = vmul.f32 %v617_v44, %v526_v52  ;;  %v883_v4 = vmul.f32 %v670_v45, %v526_v52  ;;  %v936_v18 = vmul.f32 %v723_v47, %v526_v52 }
 0x187   : > { %v567_v7 = vadd.f32 %v566_v48, %v1954_v26  ;;  %v619_v11 = vadd.f32 %v618_v58, %v1956_v27  ;;  %v725_v14 = vadd.f32 %v724_v62, %v1960_v29 }
 0x188   : > { %v485_v40 = vpop.f32.mrf.mxu2  ;;  %v514_v41 = vpop.f32.mrf.mxu3  ;;  %v778_v34 = vadd.f32 %v777_v2, %v1962_v30  ;;  %v831_v26 = vadd.f32 %v830_v3, %v1964_v31  ;;  %v937_v27 = vadd.f32 %v936_v18, %v1968_v33 }
 0x189   : > { %v494_v46 = vmul.f32 2.0, %v485_v40  ;;  %v523_v16 = vmul.f32 2.0, %v514_v41 }
 0x18b   : > { %v498_v60 = vsub.f32 %v494_v46, %v1779_v17  ;;  %v527_v8 = vsub.f32 %v523_v16, %v1785_v19  ;;  %v672_v17 = vadd.f32 %v671_v59, %v1958_v28  ;;  %v884_v19 = vadd.f32 %v883_v4, %v1966_v32 }
 0x18d   : > { %v570_v12 = vmul.f32 %v569_v49, %v498_v60  ;;  %v622_v13 = vmul.f32 %v621_v50, %v498_v60  ;;  %v675_v15 = vmul.f32 %v674_v51, %v498_v60  ;;  %v728_v20 = vmul.f32 %v727_v54, %v498_v60 }
 0x18e   : > { %v781_v36 = vmul.f32 %v569_v49, %v527_v8  ;;  %v834_v28 = vmul.f32 %v621_v50, %v527_v8  ;;  %v887_v37 = vmul.f32 %v674_v51, %v527_v8  ;;  %v940_v29 = vmul.f32 %v727_v54, %v527_v8 }
 0x18f   : > { %v571_v38 = vadd.f32 %v570_v12, %v567_v7  ;;  %v623_v39 = vadd.f32 %v622_v13, %v619_v11  ;;  %v676_v41 = vadd.f32 %v675_v15, %v672_v17  ;;  %v729_v42 = vadd.f32 %v728_v20, %v725_v14 }
 0x190   : > { %v488_v5 = vpop.f32.mrf.mxu2  ;;  %v517_v6 = vpop.f32.mrf.mxu3  ;;  %v835_v33 = vadd.f32 %v834_v28, %v831_v26  ;;  %v888_v50 = vadd.f32 %v887_v37, %v884_v19  ;;  %v941_v51 = vadd.f32 %v940_v29, %v937_v27 }
 0x191   : > { %v495_v9 = vmul.f32 2.0, %v488_v5  ;;  %v524_v10 = vmul.f32 2.0, %v517_v6 }
 0x193   : > { %v499_v21 = vsub.f32 %v495_v9, %v1792_v22  ;;  %v528_v35 = vsub.f32 %v524_v10, %v1798_v24  ;;  %v782_v24 = vadd.f32 %v781_v36, %v778_v34 }
 0x195   : > { %v574_v40 = vmul.f32 %v573_v55, %v499_v21  ;;  %v626_v22 = vmul.f32 %v625_v56, %v499_v21  ;;  %v679_v43 = vmul.f32 %v678_v53, %v499_v21  ;;  %v732_v30 = vmul.f32 %v731_v57, %v499_v21 }
 0x196   : > { %v785_v44 = vmul.f32 %v573_v55, %v528_v35  ;;  %v838_v31 = vmul.f32 %v625_v56, %v528_v35  ;;  %v891_v45 = vmul.f32 %v678_v53, %v528_v35  ;;  %v944_v54 = vmul.f32 %v731_v57, %v528_v35 }
 0x197   : > { %v575_v52 = vadd.f32 %v574_v40, %v571_v38  ;;  %v627_v55 = vadd.f32 %v626_v22, %v623_v39  ;;  %v680_v56 = vadd.f32 %v679_v43, %v676_v41  ;;  %v733_v53 = vadd.f32 %v732_v30, %v729_v42 }
 0x198   : > { %v490_v32 = vpop.f32.mrf.mxu2  ;;  %v519_v46 = vpop.f32.mrf.mxu3  ;;  %v786_v58 = vadd.f32 %v785_v44, %v782_v24  ;;  %v839_v59 = vadd.f32 %v838_v31, %v835_v33  ;;  %v892_v60 = vadd.f32 %v891_v45, %v888_v50  ;;  %v945_v9 = vadd.f32 %v944_v54, %v941_v51 }
 0x199   : > { %v496_v47 = vmul.f32 2.0, %v490_v32  ;;  %v525_v49 = vmul.f32 2.0, %v519_v46 }
 0x19b   : > { %v500_v48 = vsub.f32 %v496_v47, %v1795_v23  ;;  %v529_v16 = vsub.f32 %v525_v49, %v1801_v25 }
 0x19d   : > { %v578_v62 = vmul.f32 %v577_v61, %v500_v48  ;;  %v630_v2 = vmul.f32 %v629_v63, %v500_v48  ;;  %v683_v3 = vmul.f32 %v682_v0, %v500_v48  ;;  %v736_v57 = vmul.f32 %v735_v1, %v500_v48 }
 0x19e   : > { %v789_v4 = vmul.f32 %v577_v61, %v529_v16  ;;  %v842_v18 = vmul.f32 %v629_v63, %v529_v16  ;;  %v895_v23 = vmul.f32 %v682_v0, %v529_v16  ;;  %v948_v25 = vmul.f32 %v735_v1, %v529_v16 }
 0x19f   : > { %v579_v5 = vadd.f32 %v578_v62, %v575_v52  ;;  %v631_v6 = vadd.f32 %v630_v2, %v627_v55  ;;  %v684_v7 = vadd.f32 %v683_v3, %v680_v56  ;;  %v737_v8 = vadd.f32 %v736_v57, %v733_v53 }
 0x1a0   : > { %v790_v10 = vadd.f32 %v789_v4, %v786_v58  ;;  %v843_v11 = vadd.f32 %v842_v18, %v839_v59  ;;  %v896_v14 = vadd.f32 %v895_v23, %v892_v60  ;;  %v949_v63 = vadd.f32 %v948_v25, %v945_v9 }
 0x1a1   : > { %v580_v17 = vmax.f32 %v579_v5, 0.0  ;;  %v632_v12 = vmax.f32 %v631_v6, 0.0  ;;  %v685_v13 = vmax.f32 %v684_v7, 0.0  ;;  %v738_v61 = vmax.f32 %v737_v8, 0.0 }
 0x1a2   : > { %v791_v0 = vmax.f32 %v790_v10, 0.0  ;;  %v844_v1 = vmax.f32 %v843_v11, 0.0  ;;  %v897_v15 = vmax.f32 %v896_v14, 0.0  ;;  %v950_v20 = vmax.f32 %v949_v63, 0.0 }
 0x1a3   : > { %581 = vst [vmem:[%s288_s8] sm:$0xff] %v580_v17 }
 0x1a4   : > { %1215 = vst [vmem:[%s288_s8 + $0x8] sm:$0xff] %v632_v12 }
 0x1a5   : > { %1229 = vst [vmem:[%s288_s8 + $0x10] sm:$0xff] %v685_v13 }
 0x1a6   : > { %1243 = vst [vmem:[%s288_s8 + $0x18] sm:$0xff] %v738_v61 }
 0x1a7   : > { %1255 = vst [vmem:[%s288_s8 + $0x20] sm:$0xff] %v791_v0 }
 0x1a8   : > { %1269 = vst [vmem:[%s288_s8 + $0x28] sm:$0xff] %v844_v1 }
 0x1a9   : > { %1283 = vst [vmem:[%s288_s8 + $0x30] sm:$0xff] %v897_v15 }
 0x1aa   : > { %1297 = vst [vmem:[%s288_s8 + $0x38] sm:$0xff] %v950_v20 }
 0x1ab   : > { %1521 = shalt.err (!%p1518_p5)
}
 0x1ac   : > { %s1580_s30 = smov 128   ;;  %s1581_s12 = smov 8  }
 0x1ad   : > { %1338 = dma.vmem_to_hbm [thread:$0]  (%p1659_p11), %s968_s19, 1024, %s970_s11, %s954_s20, %s1580_s30, %s1580_s30, %s1581_s12  }
 0x1ae PF: > { %s984_s25 = sand.u32 1, %s1560_s15   ;;  %p2102_p9 = scmp.ge.s32.totalorder %s1572_s18, 2 }
 0x1af   : > { %s985_s3 = scalar_lea.sflag [#allocation4], %s984_s25 }
 0x1b0   : > { %p1355_p10 = pnand %p2102_p9, %p1663_p12 }
 0x1b2   : > { %p1356_p1 = pneg %p1355_p10 }
 0x1b4   : > { %1555 = dma.done.wait (%p1356_p1), %s985_s3, 1024  }
 0x1b5   : > { %1557 = vsyncadd (%p1356_p1), %s985_s3, 4294966272  ;;  %p22_p2 = scmp.ge.s32.totalorder %s1632_s21, 4   ;;  %s2103_s15 = smov %s1564_s16 }
 0x1b6   : > { %s2104_s16 = smov %s1568_s17  ;;  %s2105_s17 = smov %s1644_s24 }
 0x1b7   : > { %s2106_s18 = smov %s1632_s21  ;;  %24 = sbr.rel (!%p22_p2) target bundleno = 13 (0xd), region = 112 }
 0x1bc   :  { %991 = vsyncpa [#allocation3], 1 }
 0x1bd   :  { %993 = vsyncpa [#allocation3 + $0x1], 1 }
 0x1be   :  { %994 = vsyncpa [#allocation7], 1 }
 0x1bf   :  { %996 = vsyncpa [#allocation7 + $0x1], 1 }
 0x1c0   :  { %997 = vsyncpa [#allocation4], 1 }
 0x1c1   :  { %999 = vsyncpa [#allocation4 + $0x1], 1 }
 0x1c2   :  { %1000 = vsyncpa [#allocation5], 1 }
 0x1c3   :  { %1002 = vsyncpa [#allocation5 + $0x1], 1 }
 0x1c4   :  { %1003 = vsyncpa [#allocation10], 1 }

</bundles_post_ra>
